<compile_context>
chip_gen: v7x
topology: tpu7x:2x2x1
jax: 0.10.0
libtpu: 0.0.40
codegen_flags: <defaults>
</compile_context>

<pallas_src>
import functools

import jax
import jax.numpy as jnp
from jax import lax
from jax.experimental import pallas as pl
from jax.experimental.pallas import tpu as pltpu


def _round_up(x, m):
    return (x + m - 1) // m * m


def _next_pow2(x):
    return 1 << (max(int(x), 1) - 1).bit_length()


def _cond_contrastive_kernel(x_row_ref, x_col_ref, y_ref, lab_row_ref, lab_col_ref,
                             out_ref, pos_acc, all_acc, *,
                             temperature, eps, block_m, block_n):
    i = pl.program_id(0)          # row-tile index   (parallel)
    j = pl.program_id(1)          # column-tile index (reduction)

    @pl.when(j == 0)
    def _init():
        pos_acc[...] = jnp.zeros_like(pos_acc)
        all_acc[...] = jnp.zeros_like(all_acc)

    inv_t = 1.0 / temperature
    # Per-row clamp at sqrt(eps): identical to torch's max(|x||y|, eps) product
    # clamp whenever norms >= sqrt(eps) (i.e. always, except degenerate ~0 rows).
    sqrt_eps = eps ** 0.5

    xi = x_row_ref[...].astype(jnp.float32)          # [tm, D]
    xj = x_col_ref[...].astype(jnp.float32)          # [tn, D]
    lab_r = lab_row_ref[...]                         # [tm, 1] int32 (-1 = padding)
    lab_c = lab_col_ref[...]                         # [1, tn] int32 (-1 = padding)

    # O(N) reciprocal row norms (exact divide; only 2 small vectors per tile).
    inv_ni = 1.0 / jnp.maximum(
        jnp.sqrt(jnp.sum(xi * xi, axis=-1, keepdims=True)), sqrt_eps)   # [tm, 1]
    inv_nj = 1.0 / jnp.maximum(
        jnp.sqrt(jnp.sum(xj * xj, axis=-1, keepdims=True)), sqrt_eps)   # [tn, 1]

    # Normalize rows (sublane broadcasts, VPU) then one MXU matmul = cosine sims.
    # TODO(synk): for bf16 inputs, keep the raw bf16 MXU matmul and scale the f32
    # result by row/col reciprocal norms instead, to stay on the bf16 fast path.
    xin = xi * inv_ni
    xjn = xj * inv_nj
    sim = jnp.einsum("md,nd->mn", xin, xjn,
                     preferred_element_type=jnp.float32)                # [tm, tn]

    # Stable exp: cos <= 1, so (sim - 1)/T <= 0; the exp(-1/T) factor cancels in
    # numerator/denominator of the final ratio.
    e_sim = jnp.exp((sim - 1.0) * inv_t)

    # Fused mask: drop diagonal + padded columns once, reuse for both sums.
    row_g = i * block_m + lax.broadcasted_iota(jnp.int32, (block_m, block_n), 0)
    col_g = j * block_n + lax.broadcasted_iota(jnp.int32, (block_m, block_n), 1)
    keep = (row_g != col_g) & (lab_c >= 0)
    e_keep = jnp.where(keep, e_sim, 0.0)

    same = lab_r == lab_c                                               # [tm, tn]
    all_acc[...] += jnp.sum(e_keep, axis=-1, keepdims=True)
    pos_acc[...] += jnp.sum(jnp.where(same, e_keep, 0.0), axis=-1, keepdims=True)

    @pl.when(j == pl.num_programs(1) - 1)
    def _finalize():
        yi = y_ref[...].astype(jnp.float32)                             # [tm, D]
        inv_ny = 1.0 / jnp.maximum(
            jnp.sqrt(jnp.sum(yi * yi, axis=-1, keepdims=True)), sqrt_eps)
        cos_xy = jnp.sum(xi * yi, axis=-1, keepdims=True) * inv_ni * inv_ny
        emb2proxy = jnp.exp((cos_xy - 1.0) * inv_t)                     # [tm, 1]
        numerator = emb2proxy + pos_acc[...]
        denominator = emb2proxy + all_acc[...]
        nll = -jnp.log(numerator / denominator)
        # Zero padded rows so the wrapper can just sum and divide by the true N.
        out_ref[...] = jnp.where(lab_r >= 0, nll, 0.0)


def conditional_contrastive_loss(embed_data, embed_label, label, num_classes,
                                 temperature, *, block_m=256, block_n=512):
    """Pallas-backed equivalent of ConditionalContrastiveLoss.forward.

    block_m / block_n must be powers of two (block_m % 8 == 0, block_n % 128 == 0).
    Defaults (256 x 512 column slabs) keep the per-step VMEM footprint well inside
    the explicit 48 MiB budget set below (fits v7x's 64 MiB as well as v5e/v6e).
    """
    del num_classes  # the class count is implicit in the label comparison
    assert block_m % 8 == 0 and block_n % 128 == 0
    assert block_m & (block_m - 1) == 0 and block_n & (block_n - 1) == 0

    N, D = embed_data.shape
    d_pad = _round_up(D, 128)                       # lane-dense feature dim
    tn = min(block_n, max(128, _next_pow2(N)))      # multiple of 128
    tm = min(block_m, tn)                           # power of two, divides tn
    n_pad = _round_up(N, tn)                        # multiple of tm and tn

    # Pad only when needed (aligned shapes take the zero-copy path).
    if n_pad == N and d_pad == D:
        x_p, y_p = embed_data, embed_label
    else:
        x_p = jnp.zeros((n_pad, d_pad), embed_data.dtype).at[:N, :D].set(embed_data)
        y_p = jnp.zeros((n_pad, d_pad), embed_label.dtype).at[:N, :D].set(embed_label)
    lab = label.astype(jnp.int32)
    if n_pad != N:
        lab = jnp.full((n_pad,), -1, jnp.int32).at[:N].set(lab)
    lab_row = lab.reshape(n_pad, 1)                 # for [tm, 1] row-label blocks
    lab_col = lab.reshape(1, n_pad)                 # for [1, tn] col-label blocks

    grid = (n_pad // tm, n_pad // tn)
    kernel = functools.partial(
        _cond_contrastive_kernel,
        temperature=float(temperature), eps=1e-8, block_m=tm, block_n=tn)

    # TODO(synk): for very large D, add a third (arbitrary) grid axis tiling the
    # feature dim with a dot-product accumulator; not needed for typical embed dims.
    per_row = pl.pallas_call(
        kernel,
        out_shape=jax.ShapeDtypeStruct((n_pad, 1), jnp.float32),
        grid_spec=pltpu.PrefetchScalarGridSpec(
            num_scalar_prefetch=0,
            grid=grid,
            in_specs=[
                pl.BlockSpec((tm, d_pad), lambda i, j: (i, 0)),   # embed_data rows
                pl.BlockSpec((tn, d_pad), lambda i, j: (j, 0)),   # embed_data cols
                pl.BlockSpec((tm, d_pad), lambda i, j: (i, 0)),   # embed_label rows
                pl.BlockSpec((tm, 1), lambda i, j: (i, 0)),       # labels (row form)
                pl.BlockSpec((1, tn), lambda i, j: (0, j)),       # labels (col form)
            ],
            out_specs=pl.BlockSpec((tm, 1), lambda i, j: (i, 0)),
            scratch_shapes=[pltpu.VMEM((tm, 1), jnp.float32),     # pos_acc
                            pltpu.VMEM((tm, 1), jnp.float32)],    # all_acc
        ),
        compiler_params=pltpu.CompilerParams(
            dimension_semantics=("parallel", "arbitrary"),
            vmem_limit_bytes=48 * 1024 * 1024),
    )(x_p, x_p, y_p, lab_row, lab_col)

    return jnp.sum(per_row) / N


def _reference(embed_data, embed_label, label, temperature):
    """Pure-JAX reference reproducing the PyTorch forward semantics."""
    eps = 1e-8
    x = embed_data.astype(jnp.float32)
    y = embed_label.astype(jnp.float32)
    n = x.shape[0]
    xn = jnp.sqrt(jnp.sum(x * x, -1, keepdims=True))
    yn = jnp.sqrt(jnp.sum(y * y, -1, keepdims=True))
    sim = (x @ x.T) / jnp.maximum(xn * xn.T, eps)
    e_sim = jnp.exp(sim / temperature)
    off = 1.0 - jnp.eye(n, dtype=jnp.float32)
    same = (label[:, None] == label[None, :]).astype(jnp.float32)
    pos = jnp.sum(off * same * e_sim, axis=1)
    alls = jnp.sum(off * e_sim, axis=1)
    cos_xy = jnp.sum(x * y, -1) / jnp.maximum(xn[:, 0] * yn[:, 0], eps)
    p = jnp.exp(cos_xy / temperature)
    return -jnp.mean(jnp.log((p + pos) / (p + alls)))


if __name__ == "__main__":
    NUM_CLASSES = 4
    TEMPERATURE = 0.5

    root = jax.random.PRNGKey(0)

    # Case 1: tiny batch (single tile), matching the module's typical usage.
    N, D = 8, 32
    k1, k2, k3, k4, k5, k6 = jax.random.split(root, 6)
    embed_data = jax.random.normal(k1, (N, D), dtype=jnp.float32)
    embed_label = jax.random.normal(k2, (N, D), dtype=jnp.float32)
    label = jax.random.randint(k3, (N,), 0, NUM_CLASSES, dtype=jnp.int32)

    loss = jax.block_until_ready(conditional_contrastive_loss(
        embed_data, embed_label, label, NUM_CLASSES, TEMPERATURE))
    ref = jax.block_until_ready(_reference(embed_data, embed_label, label, TEMPERATURE))
    assert jnp.isfinite(loss), "loss is not finite"
    assert jnp.allclose(loss, ref, rtol=1e-4, atol=1e-4), (loss, ref)

    # Case 2: exercises multi-tile grid (2 row tiles x 2 column tiles), the running
    # accumulators, and N/D padding (200 -> 256 rows, 96 -> 128 lanes).
    N2, D2 = 200, 96
    embed_data2 = jax.random.normal(k4, (N2, D2), dtype=jnp.float32)
    embed_label2 = jax.random.normal(k5, (N2, D2), dtype=jnp.float32)
    label2 = jax.random.randint(k6, (N2,), 0, NUM_CLASSES, dtype=jnp.int32)

    loss2 = jax.block_until_ready(conditional_contrastive_loss(
        embed_data2, embed_label2, label2, NUM_CLASSES, TEMPERATURE,
        block_m=128, block_n=128))
    ref2 = jax.block_until_ready(_reference(embed_data2, embed_label2, label2, TEMPERATURE))
    assert jnp.isfinite(loss2), "loss2 is not finite"
    assert jnp.allclose(loss2, ref2, rtol=1e-4, atol=1e-4), (loss2, ref2)

    print("KERNEL_OK")
</pallas_src>

<mosaic_0001>
module attributes {stable_mosaic.version = 11 : i64} {
  func.func @_cond_contrastive_kernel(%arg0: i32, %arg1: i32, %arg2: memref<128x128xf32, #tpu.memory_space<vmem>>, %arg3: memref<128x128xf32, #tpu.memory_space<vmem>>, %arg4: memref<128x128xf32, #tpu.memory_space<vmem>>, %arg5: memref<128x1xi32, #tpu.memory_space<vmem>>, %arg6: memref<1x128xi32, #tpu.memory_space<vmem>>, %arg7: memref<128x1xf32, #tpu.memory_space<vmem>>, %arg8: memref<128x1xf32, #tpu.memory_space<vmem>>, %arg9: memref<128x1xf32, #tpu.memory_space<vmem>>) attributes {dimension_semantics = [#tpu.dimension_semantics<parallel>, #tpu.dimension_semantics<arbitrary>], iteration_bounds = array<i64: 1, 1>, scalar_prefetch = 0 : i64, scratch_operands = 2 : i64, tpu.core_type = #tpu.core_type<tc>, window_params = [{transform_indices = @transform_0, window_bounds = array<i64: 128, 128>}, {transform_indices = @transform_1, window_bounds = array<i64: 128, 128>}, {transform_indices = @transform_2, window_bounds = array<i64: 128, 128>}, {transform_indices = @transform_3, window_bounds = array<i64: 128, 1>}, {transform_indices = @transform_4, window_bounds = array<i64: 1, 128>}, {transform_indices = @transform_5, window_bounds = array<i64: 128, 1>}]} {
    %c0_i32 = arith.constant 0 : i32
    %0 = arith.cmpi eq, %arg1, %c0_i32 : i32
    %1 = arith.extui %0 : i1 to i32
    %c0_i32_0 = arith.constant 0 : i32
    %2 = arith.cmpi ne, %1, %c0_i32_0 : i32
    scf.if %2 {
      %cst_32 = arith.constant 0.000000e+00 : f32
      %66 = vector.broadcast %cst_32 : f32 to vector<128x1xf32>
      %c0_33 = arith.constant 0 : index
      %c0_34 = arith.constant 0 : index
      %67 = vector.load %arg8[%c0_33, %c0_34] : memref<128x1xf32, #tpu.memory_space<vmem>>, vector<128x1xf32>
      tpu.vector_store %arg8[%c0_33, %c0_34], %66 {strides = array<i32>} : memref<128x1xf32, #tpu.memory_space<vmem>>, vector<128x1xf32>,
      %cst_35 = arith.constant 0.000000e+00 : f32
      %68 = vector.broadcast %cst_35 : f32 to vector<128x1xf32>
      %c0_36 = arith.constant 0 : index
      %c0_37 = arith.constant 0 : index
      %69 = vector.load %arg9[%c0_36, %c0_37] : memref<128x1xf32, #tpu.memory_space<vmem>>, vector<128x1xf32>
      tpu.vector_store %arg9[%c0_36, %c0_37], %68 {strides = array<i32>} : memref<128x1xf32, #tpu.memory_space<vmem>>, vector<128x1xf32>,
    } else {
    }
    %c0 = arith.constant 0 : index
    %c0_1 = arith.constant 0 : index
    %3 = vector.load %arg2[%c0, %c0_1] : memref<128x128xf32, #tpu.memory_space<vmem>>, vector<128x128xf32>
    %c0_2 = arith.constant 0 : index
    %c0_3 = arith.constant 0 : index
    %4 = vector.load %arg3[%c0_2, %c0_3] : memref<128x128xf32, #tpu.memory_space<vmem>>, vector<128x128xf32>
    %c0_4 = arith.constant 0 : index
    %c0_5 = arith.constant 0 : index
    %5 = vector.load %arg5[%c0_4, %c0_5] : memref<128x1xi32, #tpu.memory_space<vmem>>, vector<128x1xi32>
    %c0_6 = arith.constant 0 : index
    %c0_7 = arith.constant 0 : index
    %6 = vector.load %arg6[%c0_6, %c0_7] : memref<1x128xi32, #tpu.memory_space<vmem>>, vector<1x128xi32>
    %7 = arith.mulf %3, %3 : vector<128x128xf32>
    %cst = arith.constant dense<0.000000e+00> : vector<128xf32>
    %8 = vector.multi_reduction <add>, %7, %cst [1] : vector<128x128xf32> to vector<128xf32>
    %9 = vector.shape_cast %8 : vector<128xf32> to vector<128x1xf32>
    %10 = math.sqrt %9 : vector<128x1xf32>
    %cst_8 = arith.constant 9.99999974E-5 : f32
    %11 = vector.broadcast %cst_8 : f32 to vector<128x1xf32>
    %12 = arith.maximumf %10, %11 : vector<128x1xf32>
    %cst_9 = arith.constant 1.000000e+00 : f32
    %13 = vector.broadcast %cst_9 : f32 to vector<128x1xf32>
    %14 = arith.divf %13, %12 : vector<128x1xf32>
    %15 = arith.mulf %4, %4 : vector<128x128xf32>
    %cst_10 = arith.constant dense<0.000000e+00> : vector<128xf32>
    %16 = vector.multi_reduction <add>, %15, %cst_10 [1] : vector<128x128xf32> to vector<128xf32>
    %17 = vector.shape_cast %16 : vector<128xf32> to vector<128x1xf32>
    %18 = math.sqrt %17 : vector<128x1xf32>
    %cst_11 = arith.constant 9.99999974E-5 : f32
    %19 = vector.broadcast %cst_11 : f32 to vector<128x1xf32>
    %20 = arith.maximumf %18, %19 : vector<128x1xf32>
    %cst_12 = arith.constant 1.000000e+00 : f32
    %21 = vector.broadcast %cst_12 : f32 to vector<128x1xf32>
    %22 = arith.divf %21, %20 : vector<128x1xf32>
    %23 = vector.broadcast %14 : vector<128x1xf32> to vector<128x128xf32>
    %24 = arith.mulf %3, %23 : vector<128x128xf32>
    %25 = vector.broadcast %22 : vector<128x1xf32> to vector<128x128xf32>
    %26 = arith.mulf %4, %25 : vector<128x128xf32>
    "tpu.trace_start"() <{level = 10 : i32, message = "md,nd->mn"}> : () -> ()
    %cst_13 = arith.constant dense<0.000000e+00> : vector<128x128xf32>
    %27 = tpu.matmul %24, %26, %cst_13 {dimension_numbers = #tpu.dot_dimension_numbers<[1], [1], [0], [0], [0, 0, 1, 0], [], []>} : vector<128x128xf32>, vector<128x128xf32>, vector<128x128xf32> -> vector<128x128xf32>
    "tpu.trace_stop"() : () -> ()
    %cst_14 = arith.constant 1.000000e+00 : f32
    %28 = vector.broadcast %cst_14 : f32 to vector<128x128xf32>
    %29 = arith.subf %27, %28 : vector<128x128xf32>
    %cst_15 = arith.constant 2.000000e+00 : f32
    %30 = vector.broadcast %cst_15 : f32 to vector<128x128xf32>
    %31 = arith.mulf %29, %30 : vector<128x128xf32>
    %32 = math.exp %31 : vector<128x128xf32>
    %c128_i32 = arith.constant 128 : i32
    %33 = arith.muli %arg0, %c128_i32 : i32
    %34 = tpu.iota {dimensions = array<i32: 0>} : vector<128x128xi32>
    %35 = vector.broadcast %33 : i32 to vector<128x128xi32>
    %36 = arith.addi %35, %34 : vector<128x128xi32>
    %c128_i32_16 = arith.constant 128 : i32
    %37 = arith.muli %arg1, %c128_i32_16 : i32
    %38 = tpu.iota {dimensions = array<i32: 1>} : vector<128x128xi32>
    %39 = vector.broadcast %37 : i32 to vector<128x128xi32>
    %40 = arith.addi %39, %38 : vector<128x128xi32>
    %41 = arith.cmpi ne, %36, %40 : vector<128x128xi32>
    %c0_i32_17 = arith.constant 0 : i32
    %42 = vector.broadcast %c0_i32_17 : i32 to vector<1x128xi32>
    %43 = arith.cmpi sge, %6, %42 : vector<1x128xi32>
    %44 = vector.broadcast %43 : vector<1x128xi1> to vector<128x128xi1>
    %45 = arith.andi %41, %44 : vector<128x128xi1>
    %cst_18 = arith.constant 0.000000e+00 : f32
    %46 = vector.broadcast %cst_18 : f32 to vector<128x128xf32>
    %47 = arith.select %45, %32, %46 : vector<128x128xi1>, vector<128x128xf32>
    %48 = vector.broadcast %5 : vector<128x1xi32> to vector<128x128xi32>
    %49 = vector.broadcast %6 : vector<1x128xi32> to vector<128x128xi32>
    %50 = arith.cmpi eq, %48, %49 : vector<128x128xi32>
    %c0_19 = arith.constant 0 : index
    %c0_20 = arith.constant 0 : index
    %51 = vector.load %arg9[%c0_19, %c0_20] : memref<128x1xf32, #tpu.memory_space<vmem>>, vector<128x1xf32>
    %cst_21 = arith.constant dense<0.000000e+00> : vector<128xf32>
    %52 = vector.multi_reduction <add>, %47, %cst_21 [1] : vector<128x128xf32> to vector<128xf32>
    %53 = vector.shape_cast %52 : vector<128xf32> to vector<128x1xf32>
    %54 = arith.addf %51, %53 : vector<128x1xf32>
    %c0_22 = arith.constant 0 : index
    %c0_23 = arith.constant 0 : index
    %55 = vector.load %arg9[%c0_22, %c0_23] : memref<128x1xf32, #tpu.memory_space<vmem>>, vector<128x1xf32>
    tpu.vector_store %arg9[%c0_22, %c0_23], %54 {strides = array<i32>} : memref<128x1xf32, #tpu.memory_space<vmem>>, vector<128x1xf32>,
    %c0_24 = arith.constant 0 : index
    %c0_25 = arith.constant 0 : index
    %56 = vector.load %arg8[%c0_24, %c0_25] : memref<128x1xf32, #tpu.memory_space<vmem>>, vector<128x1xf32>
    %cst_26 = arith.constant 0.000000e+00 : f32
    %57 = vector.broadcast %cst_26 : f32 to vector<128x128xf32>
    %58 = arith.select %50, %47, %57 : vector<128x128xi1>, vector<128x128xf32>
    %cst_27 = arith.constant dense<0.000000e+00> : vector<128xf32>
    %59 = vector.multi_reduction <add>, %58, %cst_27 [1] : vector<128x128xf32> to vector<128xf32>
    %60 = vector.shape_cast %59 : vector<128xf32> to vector<128x1xf32>
    %61 = arith.addf %56, %60 : vector<128x1xf32>
    %c0_28 = arith.constant 0 : index
    %c0_29 = arith.constant 0 : index
    %62 = vector.load %arg8[%c0_28, %c0_29] : memref<128x1xf32, #tpu.memory_space<vmem>>, vector<128x1xf32>
    tpu.vector_store %arg8[%c0_28, %c0_29], %61 {strides = array<i32>} : memref<128x1xf32, #tpu.memory_space<vmem>>, vector<128x1xf32>,
    %c0_i32_30 = arith.constant 0 : i32
    %63 = arith.cmpi eq, %arg1, %c0_i32_30 : i32
    %64 = arith.extui %63 : i1 to i32
    %c0_i32_31 = arith.constant 0 : i32
    %65 = arith.cmpi ne, %64, %c0_i32_31 : i32
    scf.if %65 {
      %c0_32 = arith.constant 0 : index
      %c0_33 = arith.constant 0 : index
      %66 = vector.load %arg4[%c0_32, %c0_33] : memref<128x128xf32, #tpu.memory_space<vmem>>, vector<128x128xf32>
      %67 = arith.mulf %66, %66 : vector<128x128xf32>
      %cst_34 = arith.constant dense<0.000000e+00> : vector<128xf32>
      %68 = vector.multi_reduction <add>, %67, %cst_34 [1] : vector<128x128xf32> to vector<128xf32>
      %69 = vector.shape_cast %68 : vector<128xf32> to vector<128x1xf32>
      %70 = math.sqrt %69 : vector<128x1xf32>
      %cst_35 = arith.constant 9.99999974E-5 : f32
      %71 = vector.broadcast %cst_35 : f32 to vector<128x1xf32>
      %72 = arith.maximumf %70, %71 : vector<128x1xf32>
      %cst_36 = arith.constant 1.000000e+00 : f32
      %73 = vector.broadcast %cst_36 : f32 to vector<128x1xf32>
      %74 = arith.divf %73, %72 : vector<128x1xf32>
      %75 = arith.mulf %3, %66 : vector<128x128xf32>
      %cst_37 = arith.constant dense<0.000000e+00> : vector<128xf32>
      %76 = vector.multi_reduction <add>, %75, %cst_37 [1] : vector<128x128xf32> to vector<128xf32>
      %77 = vector.shape_cast %76 : vector<128xf32> to vector<128x1xf32>
      %78 = arith.mulf %77, %14 : vector<128x1xf32>
      %79 = arith.mulf %78, %74 : vector<128x1xf32>
      %cst_38 = arith.constant 1.000000e+00 : f32
      %80 = vector.broadcast %cst_38 : f32 to vector<128x1xf32>
      %81 = arith.subf %79, %80 : vector<128x1xf32>
      %cst_39 = arith.constant 2.000000e+00 : f32
      %82 = vector.broadcast %cst_39 : f32 to vector<128x1xf32>
      %83 = arith.mulf %81, %82 : vector<128x1xf32>
      %84 = math.exp %83 : vector<128x1xf32>
      %c0_40 = arith.constant 0 : index
      %c0_41 = arith.constant 0 : index
      %85 = vector.load %arg8[%c0_40, %c0_41] : memref<128x1xf32, #tpu.memory_space<vmem>>, vector<128x1xf32>
      %86 = arith.addf %84, %85 : vector<128x1xf32>
      %c0_42 = arith.constant 0 : index
      %c0_43 = arith.constant 0 : index
      %87 = vector.load %arg9[%c0_42, %c0_43] : memref<128x1xf32, #tpu.memory_space<vmem>>, vector<128x1xf32>
      %88 = arith.addf %84, %87 : vector<128x1xf32>
      %89 = arith.divf %86, %88 : vector<128x1xf32>
      %90 = math.log %89 : vector<128x1xf32>
      %cst_44 = arith.constant 0.000000e+00 : f32
      %91 = vector.broadcast %cst_44 : f32 to vector<128x1xf32>
      %92 = arith.subf %91, %90 : vector<128x1xf32>
      %c0_i32_45 = arith.constant 0 : i32
      %93 = vector.broadcast %c0_i32_45 : i32 to vector<128x1xi32>
      %94 = arith.cmpi sge, %5, %93 : vector<128x1xi32>
      %cst_46 = arith.constant 0.000000e+00 : f32
      %95 = vector.broadcast %cst_46 : f32 to vector<128x1xf32>
      %96 = arith.select %94, %92, %95 : vector<128x1xi1>, vector<128x1xf32>
      %c0_47 = arith.constant 0 : index
      %c0_48 = arith.constant 0 : index
      %97 = vector.load %arg7[%c0_47, %c0_48] : memref<128x1xf32, #tpu.memory_space<vmem>>, vector<128x1xf32>
      tpu.vector_store %arg7[%c0_47, %c0_48], %96 {strides = array<i32>} : memref<128x1xf32, #tpu.memory_space<vmem>>, vector<128x1xf32>,
    } else {
    }
    return
  }
  func.func @transform_0(%arg0: i32, %arg1: i32) -> (i32, i32) {
    %c0_i32 = arith.constant 0 : i32
    %c0_i32_0 = arith.constant 0 : i32
    return %arg0, %c0_i32 : i32, i32
  }
  func.func @transform_1(%arg0: i32, %arg1: i32) -> (i32, i32) {
    %c0_i32 = arith.constant 0 : i32
    %c0_i32_0 = arith.constant 0 : i32
    return %arg1, %c0_i32 : i32, i32
  }
  func.func @transform_2(%arg0: i32, %arg1: i32) -> (i32, i32) {
    %c0_i32 = arith.constant 0 : i32
    %c0_i32_0 = arith.constant 0 : i32
    return %arg0, %c0_i32 : i32, i32
  }
  func.func @transform_3(%arg0: i32, %arg1: i32) -> (i32, i32) {
    %c0_i32 = arith.constant 0 : i32
    %c0_i32_0 = arith.constant 0 : i32
    return %arg0, %c0_i32 : i32, i32
  }
  func.func @transform_4(%arg0: i32, %arg1: i32) -> (i32, i32) {
    %c0_i32 = arith.constant 0 : i32
    %c0_i32_0 = arith.constant 0 : i32
    return %c0_i32, %arg1 : i32, i32
  }
  func.func @transform_5(%arg0: i32, %arg1: i32) -> (i32, i32) {
    %c0_i32 = arith.constant 0 : i32
    %c0_i32_0 = arith.constant 0 : i32
    return %arg0, %c0_i32 : i32, i32
  }
}

</mosaic_0001>

<bundles_post_ra>
// kernel: tpu_custom_call.1
= control target key start
LH: loop header
LB: loop body
LE: loop exit
PB: predicated region body
PF: predicated region fallthrough
CT: control target
= control target key end

     0   :  { %10 = vsyncpa [#allocation5], 0  ;;  %s3884_s0 = inlined_call_operand.vmem [shape: f32[128,128], index: 0, kind: input, shape index: {}]   ;;  %s3885_s1 = inlined_call_operand.hbm [shape: f32[128,128], index: 1, kind: input, shape index: {}]   ;;  %s3886_s2 = inlined_call_operand.hbm [shape: f32[128,128], index: 2, kind: input, shape index: {}]   ;;  %s3887_s3 = inlined_call_operand.vmem [shape: s32[128,1], index: 3, kind: input, shape index: {}]   ;;  %s3888_s4 = inlined_call_operand.vmem [shape: s32[1,128], index: 4, kind: input, shape index: {}]   ;;  %s3889_s5 = inlined_call_operand.vmem [shape: f32[128,1], index: 5, kind: output, shape index: {}]  }
   0x1   :  { %11 = vsyncpa [#allocation7], 0  ;;  %s2278_s18 = smov [#allocation4]   ;;  %s2230_s22 = scalar_lea.hbm %s3885_s1, 2048 }
   0x2   :  { %s19_s19 = sshll.u32 %s2278_s18, 4  ;;  %p2231_p0 = scmp.ne.s32.totalorder %s3885_s1, %s2230_s22  ;;  %s20_s19 = int_to_ptr.vmem [resolvable:$true] %s19_s19 }
   0x3   :  { %p2234_p1 = scmp.lt.u32.totalorder %s2230_s22, %s3885_s1 }
   0x5   :  { %p2236_p2 = pnand %p2234_p1, %p2231_p0 }
   0x7   :  { %2239 = shalt.err (!%p2236_p2)
}
   0x8   :  { %s2240_s27 = scalar_lea.vmem %s20_s19, 2048  ;;  %p2245_p4 = scmp.lt.s32.totalorder %s20_s19, %s20_s19 }
   0x9   :  { %p2241_p3 = scmp.ne.s32.totalorder %s20_s19, %s2240_s27  ;;  %p2246_p5 = scmp.lt.s32.totalorder %s2240_s27, %s2240_s27 }
   0xb   :  { %p2247_p6 = por %p2246_p5, %p2245_p4 }
   0xd   :  { %p2248_p7 = pnand %p2247_p6, %p2241_p3 }
   0xf   :  { %2251 = shalt.err (!%p2248_p7)
}
  0x10   :  { %s2279_s28 = smov 128   ;;  %s2280_s29 = smov 8  }
  0x11   :  { %25 = dma.hbm_to_vmem [thread:$0]  %s3885_s1, 2048, %s20_s19, [#allocation5], %s2279_s28, %s2279_s28, %s2280_s29  }
  0x12   :  { %s2281_s7 = smov [#allocation6]   ;;  %s2252_s11 = scalar_lea.hbm %s3886_s2, 2048 }
  0x13   :  { %s31_s8 = sshll.u32 %s2281_s7, 4  ;;  %p2253_p8 = scmp.ne.s32.totalorder %s3886_s2, %s2252_s11  ;;  %s32_s8 = int_to_ptr.vmem [resolvable:$true] %s31_s8 }
  0x14   :  { %p2256_p9 = scmp.lt.u32.totalorder %s2252_s11, %s3886_s2 }
  0x16   :  { %p2258_p10 = pnand %p2256_p9, %p2253_p8 }
  0x18   :  { %2261 = shalt.err (!%p2258_p10)
}
  0x19   :  { %s2262_s16 = scalar_lea.vmem %s32_s8, 2048  ;;  %p2267_p12 = scmp.lt.s32.totalorder %s32_s8, %s32_s8 }
  0x1a   :  { %p2263_p11 = scmp.ne.s32.totalorder %s32_s8, %s2262_s16  ;;  %p2268_p13 = scmp.lt.s32.totalorder %s2262_s16, %s2262_s16 }
  0x1c   :  { %p2269_p0 = por %p2268_p13, %p2267_p12 }
  0x1e   :  { %p2270_p1 = pnand %p2269_p0, %p2263_p11 }
  0x20   :  { %2273 = shalt.err (!%p2270_p1)
}
  0x21   :  { %37 = dma.hbm_to_vmem [thread:$0]  %s3886_s2, 2048, %s32_s8, [#allocation7], %s2279_s28, %s2279_s28, %s2280_s29  }
  0x22   :  { %2274 = dma.done.wait [#allocation5], 2048  }
  0x23   :  { %2275 = vsyncadd [#allocation5], 4294965248 }
  0x24   :  { %2276 = dma.done.wait [#allocation7], 2048  }
  0x25   :  { %2277 = vsyncadd [#allocation7], 4294965248  ;;  %v3890_v0 = vmov 0   ;;  %v2340_v1 = vld [vmem:[#allocation4 + $0x10] sm:$0xff]  ;;  %v2342_v2 = vld [vmem:[#allocation4] sm:$0xff] }
  0x26   :  { %1875 = vset.pattern.permute.xlu1 %v3890_v0  ;;  %1874 = vset.pattern.permute.xlu0 %v3890_v0  ;;  %v2344_v3 = vld [vmem:[#allocation4 + $0x18] sm:$0xff]  ;;  %v344_v4 = vmul.f32 %v2340_v1, %v2340_v1  ;;  %v342_v5 = vmul.f32 %v2342_v2, %v2342_v2  ;;  %v2350_v6 = vld [vmem:[#allocation4 + $0x8] sm:$0xff]  ;;  %v2358_v10 = vld [vmem:[#allocation4 + $0x20] sm:$0xff] }
  0x27   :  { %v345_v7 = vmul.f32 %v2344_v3, %v2344_v3  ;;  %v343_v8 = vmul.f32 %v2350_v6, %v2350_v6  ;;  %v2356_v9 = vld [vmem:[#allocation4 + $0x28] sm:$0xff]  ;;  %v346_v12 = vmul.f32 %v2358_v10, %v2358_v10  ;;  %v2364_v13 = vld [vmem:[#allocation4 + $0x38] sm:$0xff]  ;;  %v2366_v14 = vld [vmem:[#allocation4 + $0x30] sm:$0xff] }
  0x28   :  { %362 = vadd.xlane.f32.xlu1 %v344_v4  ;;  %358 = vadd.xlane.f32.xlu0 %v342_v5  ;;  %v347_v11 = vmul.f32 %v2356_v9, %v2356_v9  ;;  %v349_v15 = vmul.f32 %v2364_v13, %v2364_v13  ;;  %v348_v16 = vmul.f32 %v2366_v14, %v2366_v14  ;;  %v2372_v17 = vld [vmem:[#allocation4 + $0x48] sm:$0xff]  ;;  %v2374_v18 = vld [vmem:[#allocation4 + $0x40] sm:$0xff]  ;;  %v2380_v21 = vld [vmem:[#allocation4 + $0x58] sm:$0xff] }
  0x29   :  { %v351_v19 = vmul.f32 %v2372_v17, %v2372_v17  ;;  %v350_v20 = vmul.f32 %v2374_v18, %v2374_v18  ;;  %3895 = vst [vmem:[#allocation10_spill] sm:$0xff] %v2380_v21  ;;  %v2382_v22 = vld [vmem:[#allocation4 + $0x50] sm:$0xff]  ;;  %v353_v23 = vmul.f32 %v2380_v21, %v2380_v21  ;;  %v2388_v25 = vld [vmem:[#allocation4 + $0x68] sm:$0xff]  ;;  %v2390_v26 = vld [vmem:[#allocation4 + $0x60] sm:$0xff] }
  0x2a   :  { %3896 = vst [vmem:[#allocation11_spill] sm:$0xff] %v2382_v22  ;;  %v352_v24 = vmul.f32 %v2382_v22, %v2382_v22  ;;  %3897 = vst [vmem:[#allocation12_spill] sm:$0xff] %v2388_v25  ;;  %v355_v27 = vmul.f32 %v2388_v25, %v2388_v25  ;;  %v354_v28 = vmul.f32 %v2390_v26, %v2390_v26  ;;  %v116_v29 = vld [vmem:[#allocation4 + $0x78] sm:$0xff]  ;;  %v115_v30 = vld [vmem:[#allocation4 + $0x70] sm:$0xff] }
  0x2b   :  { %3898 = vst [vmem:[#allocation13_spill] sm:$0xff] %v2390_v26  ;;  %v357_v31 = vmul.f32 %v116_v29, %v116_v29  ;;  %v356_v32 = vmul.f32 %v115_v30, %v115_v30  ;;  %v2399_v33 = vld [vmem:[%s3884_s0 + $0x40] sm:$0xff]  ;;  %v2413_v37 = vld [vmem:[%s3884_s0 + $0x48] sm:$0xff]  ;;  %v2427_v41 = vld [vmem:[%s3884_s0 + $0x50] sm:$0xff] }
  0x2c   :  { %364 = vadd.xlane.f32.xlu1 %v345_v7  ;;  %360 = vadd.xlane.f32.xlu0 %v343_v8  ;;  %v2404_v34 = vld [vmem:[%s3884_s0] sm:$0xff]  ;;  %v142_v35 = vmul.f32 %v2399_v33, %v2399_v33  ;;  %v2418_v38 = vld [vmem:[%s3884_s0 + $0x8] sm:$0xff]  ;;  %v143_v39 = vmul.f32 %v2413_v37, %v2413_v37  ;;  %v2432_v42 = vld [vmem:[%s3884_s0 + $0x10] sm:$0xff]  ;;  %v144_v43 = vmul.f32 %v2427_v41, %v2427_v41 }
  0x2d   :  { %v134_v36 = vmul.f32 %v2404_v34, %v2404_v34  ;;  %v135_v40 = vmul.f32 %v2418_v38, %v2418_v38  ;;  %v136_v44 = vmul.f32 %v2432_v42, %v2432_v42  ;;  %v2441_v45 = vld [vmem:[%s3884_s0 + $0x58] sm:$0xff]  ;;  %v2455_v49 = vld [vmem:[%s3884_s0 + $0x60] sm:$0xff]  ;;  %v2469_v53 = vld [vmem:[%s3884_s0 + $0x68] sm:$0xff] }
  0x2e   :  { %v2446_v46 = vld [vmem:[%s3884_s0 + $0x18] sm:$0xff]  ;;  %v145_v47 = vmul.f32 %v2441_v45, %v2441_v45  ;;  %v2460_v50 = vld [vmem:[%s3884_s0 + $0x20] sm:$0xff]  ;;  %v146_v51 = vmul.f32 %v2455_v49, %v2455_v49  ;;  %v2474_v54 = vld [vmem:[%s3884_s0 + $0x28] sm:$0xff]  ;;  %v147_v55 = vmul.f32 %v2469_v53, %v2469_v53 }
  0x2f   :  { %v137_v48 = vmul.f32 %v2446_v46, %v2446_v46  ;;  %v138_v52 = vmul.f32 %v2460_v50, %v2460_v50  ;;  %v139_v56 = vmul.f32 %v2474_v54, %v2474_v54  ;;  %v2483_v57 = vld [vmem:[%s3884_s0 + $0x70] sm:$0xff]  ;;  %v2497_v61 = vld [vmem:[%s3884_s0 + $0x78] sm:$0xff]  ;;  %v118_v5 = vld [vmem:[%s3887_s3 + $0x8] sm:$0xff] }
  0x30   :  { %368 = vadd.xlane.f32.xlu1 %v347_v11  ;;  %366 = vadd.xlane.f32.xlu0 %v346_v12  ;;  %v2488_v58 = vld [vmem:[%s3884_s0 + $0x30] sm:$0xff]  ;;  %v148_v59 = vmul.f32 %v2483_v57, %v2483_v57  ;;  %v2502_v62 = vld [vmem:[%s3884_s0 + $0x38] sm:$0xff]  ;;  %v149_v63 = vmul.f32 %v2497_v61, %v2497_v61  ;;  %v117_v8 = vld [vmem:[%s3887_s3] sm:$0xff] }
  0x31   :  { %v140_v60 = vmul.f32 %v2488_v58, %v2488_v58  ;;  %v141_v4 = vmul.f32 %v2502_v62, %v2502_v62  ;;  %v119_v7 = vld [vmem:[%s3887_s3 + $0x10] sm:$0xff]  ;;  %v120_v11 = vld [vmem:[%s3887_s3 + $0x18] sm:$0xff]  ;;  %v126_v12 = vld [vmem:[%s3887_s3 + $0x48] sm:$0xff] }
  0x32   :  { %v127_v29 = vld [vmem:[%s3887_s3 + $0x50] sm:$0xff]  ;;  %v129_v30 = vld [vmem:[%s3887_s3 + $0x60] sm:$0xff] }
  0x34   :  { %372 = vadd.xlane.f32.xlu1 %v349_v15  ;;  %370 = vadd.xlane.f32.xlu0 %v348_v16  ;;  %v121_v15 = vld [vmem:[%s3887_s3 + $0x20] sm:$0xff]  ;;  %v128_v16 = vld [vmem:[%s3887_s3 + $0x58] sm:$0xff] }
  0x38   :  { %376 = vadd.xlane.f32.xlu1 %v351_v19  ;;  %374 = vadd.xlane.f32.xlu0 %v350_v20  ;;  %v122_v19 = vld [vmem:[%s3887_s3 + $0x28] sm:$0xff] }
  0x39   :  { %v130_v20 = vld [vmem:[%s3887_s3 + $0x68] sm:$0xff] }
  0x3c   :  { %380 = vadd.xlane.f32.xlu1 %v353_v23  ;;  %378 = vadd.xlane.f32.xlu0 %v352_v24  ;;  %v123_v23 = vld [vmem:[%s3887_s3 + $0x30] sm:$0xff]  ;;  %v132_v24 = vld [vmem:[%s3887_s3 + $0x78] sm:$0xff] }
  0x40   :  { %384 = vadd.xlane.f32.xlu1 %v355_v27  ;;  %382 = vadd.xlane.f32.xlu0 %v354_v28  ;;  %v124_v27 = vld [vmem:[%s3887_s3 + $0x38] sm:$0xff]  ;;  %v125_v28 = vld [vmem:[%s3887_s3 + $0x40] sm:$0xff] }
  0x44   :  { %388 = vadd.xlane.f32.xlu1 %v357_v31  ;;  %386 = vadd.xlane.f32.xlu0 %v356_v32  ;;  %v131_v31 = vld [vmem:[%s3887_s3 + $0x70] sm:$0xff]  ;;  %v2556_v32 = vld [vmem:[#allocation6 + $0x8] sm:$0xff] }
  0x48   :  { %166 = vadd.xlane.f32.xlu1 %v142_v35  ;;  %150 = vadd.xlane.f32.xlu0 %v134_v36  ;;  %v1151_v35 = vmul.f32 %v2556_v32, %v2556_v32  ;;  %v1136_v36 = vld [vmem:[#allocation6 + $0x10] sm:$0xff] }
  0x4c   :  { %168 = vadd.xlane.f32.xlu1 %v143_v39  ;;  %152 = vadd.xlane.f32.xlu0 %v135_v40  ;;  %v1152_v39 = vmul.f32 %v1136_v36, %v1136_v36  ;;  %v1138_v40 = vld [vmem:[#allocation6 + $0x20] sm:$0xff] }
  0x50   :  { %170 = vadd.xlane.f32.xlu1 %v144_v43  ;;  %154 = vadd.xlane.f32.xlu0 %v136_v44  ;;  %v1154_v43 = vmul.f32 %v1138_v40, %v1138_v40  ;;  %v2560_v44 = vld [vmem:[#allocation6 + $0x30] sm:$0xff] }
  0x54   :  { %172 = vadd.xlane.f32.xlu1 %v145_v47  ;;  %156 = vadd.xlane.f32.xlu0 %v137_v48  ;;  %v1156_v47 = vmul.f32 %v2560_v44, %v2560_v44  ;;  %v2564_v48 = vld [vmem:[#allocation6 + $0x40] sm:$0xff] }
  0x58   :  { %174 = vadd.xlane.f32.xlu1 %v146_v51  ;;  %158 = vadd.xlane.f32.xlu0 %v138_v52 }
  0x5c   :  { %176 = vadd.xlane.f32.xlu1 %v147_v55  ;;  %160 = vadd.xlane.f32.xlu0 %v139_v56  ;;  %v1158_v55 = vmul.f32 %v2564_v48, %v2564_v48  ;;  %v2570_v56 = vld [vmem:[#allocation6 + $0x50] sm:$0xff] }
  0x60   :  { %178 = vadd.xlane.f32.xlu1 %v148_v59  ;;  %162 = vadd.xlane.f32.xlu0 %v140_v60 }
  0x64   :  { %180 = vadd.xlane.f32.xlu1 %v149_v63  ;;  %164 = vadd.xlane.f32.xlu0 %v141_v4  ;;  %v1160_v63 = vmul.f32 %v2570_v56, %v2570_v56  ;;  %v1134_v4 = vld [vmem:[#allocation6] sm:$0xff] }
  0x75   :  { %890 = vperm.xlu1 %1875, %v118_v5   ;;  %v2580_v5 = vld [vmem:[#allocation6 + $0x60] sm:$0xff] }
  0x79   :  { %893 = vperm.xlu1 %1875, %v119_v7   ;;  %v2582_v7 = vld [vmem:[#allocation6 + $0x18] sm:$0xff] }
  0x7a   :  { %887 = vperm.xlu0 %1874, %v117_v8   ;;  %v2585_v8 = vld [vmem:[#allocation6 + $0x70] sm:$0xff] }
  0x7d   :  { %896 = vperm.xlu1 %1875, %v120_v11   ;;  %v2587_v11 = vld [vmem:[#allocation6 + $0x28] sm:$0xff] }
  0x7e   :  { %914 = vperm.xlu0 %1874, %v126_v12   ;;  %v2589_v12 = vld [vmem:[#allocation6 + $0x38] sm:$0xff] }
  0x81   :  { %899 = vperm.xlu1 %1875, %v121_v15   ;;  %v2591_v15 = vld [vmem:[#allocation6 + $0x48] sm:$0xff] }
  0x82   :  { %920 = vperm.xlu0 %1874, %v128_v16  }
  0x85   :  { %902 = vperm.xlu1 %1875, %v122_v19  }
  0x86   :  { %926 = vperm.xlu0 %1874, %v130_v20   ;;  %v1150_v20 = vmul.f32 %v1134_v4, %v1134_v4 }
  0x89   :  { %905 = vperm.xlu1 %1875, %v123_v23   ;;  %v1162_v23 = vmul.f32 %v2580_v5, %v2580_v5 }
  0x8a   :  { %932 = vperm.xlu0 %1874, %v132_v24   ;;  %v1153_v24 = vmul.f32 %v2582_v7, %v2582_v7 }
  0x8d   :  { %908 = vperm.xlu1 %1875, %v124_v27   ;;  %v1164_v27 = vmul.f32 %v2585_v8, %v2585_v8 }
  0x91   :  { %911 = vperm.xlu1 %1875, %v125_v28   ;;  %v1155_v28 = vmul.f32 %v2587_v11, %v2587_v11 }
  0x95   :  { %917 = vperm.xlu1 %1875, %v127_v29   ;;  %v1358_v29 = vmul.f32 %v1134_v4, %v2404_v34 }
  0x99   :  { %923 = vperm.xlu1 %1875, %v129_v30   ;;  %v2610_v30 = vmul.f32 %v2589_v12, %v2589_v12 }
  0x9d   :  { %929 = vperm.xlu1 %1875, %v131_v31   ;;  %v2613_v31 = vmul.f32 %v1136_v36, %v2432_v42 }
  0xa9   :  { %1168 = vadd.xlane.f32.xlu0 %v1151_v35  ;;  %v2617_v35 = vmul.f32 %v2591_v15, %v2591_v15 }
  0xad   :  { %1170 = vadd.xlane.f32.xlu0 %v1152_v39 }
  0xb1   :  { %1174 = vadd.xlane.f32.xlu0 %v1154_v43 }
  0xb5   :  { %v363_v51 = vpop.xlane.xlu1 %362  ;;  %v2566_v52 = vpop.xlane.xlu0 %358  ;;  %1178 = vadd.xlane.f32.xlu0 %v1156_v47  ;;  %v2620_v47 = vmul.f32 %v1138_v40, %v2460_v50 }
  0xb6   :  { %1876 = vrsqrt.f32 %v363_v51  ;;  %vm406_vm0 = vcmp.eq.f32.partialorder %v363_v51, inf  ;;  %vm408_vm1 = vcmp.eq.f32.partialorder %v363_v51, 0.0  ;;  %v409_v43 = vand.u32 2147483648, %v363_v51 }
  0xb7   :  { %1878 = vrsqrt.f32 %v2566_v52  ;;  %vm392_vm2 = vcmp.eq.f32.partialorder %v2566_v52, inf  ;;  %vm394_vm3 = vcmp.eq.f32.partialorder %v2566_v52, 0.0  ;;  %v395_v42 = vand.u32 2147483648, %v2566_v52 }
  0xb9   :  { %v2573_v59 = vpop.xlane.xlu1 %364  ;;  %v2575_v60 = vpop.xlane.xlu0 %360  ;;  %1182 = vadd.xlane.f32.xlu0 %v1158_v55 }
  0xba   :  { %1880 = vrsqrt.f32 %v2573_v59  ;;  %vm413_vm4 = vcmp.eq.f32.partialorder %v2573_v59, inf  ;;  %vm415_vm5 = vcmp.eq.f32.partialorder %v2573_v59, 0.0  ;;  %v416_v40 = vand.u32 2147483648, %v2573_v59 }
  0xbb   :  { %1882 = vrsqrt.f32 %v2575_v60  ;;  %vm399_vm6 = vcmp.eq.f32.partialorder %v2575_v60, inf  ;;  %vm401_vm7 = vcmp.eq.f32.partialorder %v2575_v60, 0.0 }
  0xbd   :  { %v2593_v16 = vpop.xlane.xlu1 %368  ;;  %v2595_v19 = vpop.xlane.xlu0 %366  ;;  %1186 = vadd.xlane.f32.xlu0 %v1160_v63 }
  0xbe   :  { %1884 = vrsqrt.f32 %v2593_v16  ;;  %vm427_vm8 = vcmp.eq.f32.partialorder %v2593_v16, inf  ;;  %vm429_vm9 = vcmp.eq.f32.partialorder %v2593_v16, 0.0  ;;  %vm420_vm10 = vcmp.eq.f32.partialorder %v2595_v19, inf }
  0xbf   :  { %1886 = vrsqrt.f32 %v2595_v19  ;;  %vm422_vm11 = vcmp.eq.f32.partialorder %v2595_v19, 0.0 }
  0xc0   :  { %v1877_v39 = vpop.eup %1876 }
  0xc1   :  { %v1879_v34 = vpop.eup %1878  ;;  %v405_v55 = vmul.f32 %v1877_v39, %v363_v51  ;;  %1166 = vadd.xlane.f32.xlu1 %v1150_v20  ;;  %1190 = vadd.xlane.f32.xlu0 %v1162_v23  ;;  %v2625_v36 = vpop.xlane.xlu1 %372 }
  0xc2   :  { %v2627_v63 = vpop.xlane.xlu0 %370  ;;  %v391_v4 = vmul.f32 %v1879_v34, %v2566_v52  ;;  %1888 = vrsqrt.f32 %v2625_v36  ;;  %v402_v34 = vand.u32 2147483648, %v2575_v60  ;;  %vm441_vm12 = vcmp.eq.f32.partialorder %v2625_v36, inf }
  0xc3   :  { %v407_v50 = vsel %vm406_vm0, %v363_v51, %v405_v55  ;;  %1890 = vrsqrt.f32 %v2627_v63  ;;  %vm443_vm13 = vcmp.eq.f32.partialorder %v2625_v36, 0.0  ;;  %vm434_vm14 = vcmp.eq.f32.partialorder %v2627_v63, inf }
  0xc4   :  { %v1881_v20 = vpop.eup %1880  ;;  %v410_v23 = vsel %vm408_vm1, %v409_v43, %v407_v50  ;;  %v393_v39 = vsel %vm392_vm2, %v2566_v52, %v391_v4  ;;  %vm436_vm15 = vcmp.eq.f32.partialorder %v2627_v63, 0.0 }
  0xc5   :  { %v1883_v0 = vpop.eup %1882  ;;  %v504_v25 = vmax.f32 %v410_v23, 0.0001  ;;  %v396_v55 = vsel %vm394_vm3, %v395_v42, %v393_v39  ;;  %v412_v26 = vmul.f32 %v1881_v20, %v2573_v59  ;;  %1172 = vadd.xlane.f32.xlu1 %v1153_v24  ;;  %1194 = vadd.xlane.f32.xlu0 %v1164_v27  ;;  %v2647_v51 = vpop.xlane.xlu1 %376  ;;  %v430_v42 = vand.u32 2147483648, %v2593_v16 }
  0xc6   :  { %v2649_v43 = vpop.xlane.xlu0 %374  ;;  %v502_v4 = vmax.f32 %v396_v55, 0.0001  ;;  %v398_v50 = vmul.f32 %v1883_v0, %v2575_v60  ;;  %1892 = vrsqrt.f32 %v2647_v51  ;;  %v423_v20 = vand.u32 2147483648, %v2595_v19 }
  0xc7   :  { %v414_v52 = vsel %vm413_vm4, %v2573_v59, %v412_v26  ;;  %1894 = vrcp.f32 %v504_v25  ;;  %vm455_vm0 = vcmp.eq.f32.partialorder %v2647_v51, inf  ;;  %vm457_vm1 = vcmp.eq.f32.partialorder %v2647_v51, 0.0 }
  0xc8   :  { %v1885_v24 = vpop.eup %1884  ;;  %v417_v27 = vsel %vm415_vm5, %v416_v40, %v414_v52  ;;  %v400_v0 = vsel %vm399_vm6, %v2575_v60, %v398_v50  ;;  %1896 = vrsqrt.f32 %v2649_v43  ;;  %vm448_vm2 = vcmp.eq.f32.partialorder %v2649_v43, inf }
  0xc9   :  { %v1887_v23 = vpop.eup %1886  ;;  %v505_v39 = vmax.f32 %v417_v27, 0.0001  ;;  %v403_v26 = vsel %vm401_vm7, %v402_v34, %v400_v0  ;;  %v426_v55 = vmul.f32 %v1885_v24, %v2593_v16  ;;  %1176 = vadd.xlane.f32.xlu1 %v1155_v28  ;;  %1374 = vadd.xlane.f32.xlu0 %v1358_v29  ;;  %v2670_v25 = vpop.xlane.xlu1 %380  ;;  %1898 = vrcp.f32 %v502_v4 }
  0xca   :  { %v2672_v59 = vpop.xlane.xlu0 %378  ;;  %v503_v40 = vmax.f32 %v403_v26, 0.0001  ;;  %v419_v50 = vmul.f32 %v1887_v23, %v2595_v19  ;;  %v444_v28 = vand.u32 2147483648, %v2625_v36  ;;  %vm450_vm3 = vcmp.eq.f32.partialorder %v2649_v43, 0.0 }
  0xcb   :  { %1900 = vrcp.f32 %v505_v39  ;;  %v428_v60 = vsel %vm427_vm8, %v2593_v16, %v426_v55  ;;  %v2693_v16 = vld [vmem:[#allocation6 + $0x58] sm:$0xff]  ;;  %vm469_vm4 = vcmp.eq.f32.partialorder %v2670_v25, inf  ;;  %vm462_vm5 = vcmp.eq.f32.partialorder %v2672_v59, inf }
  0xcc   :  { %v1889_v29 = vpop.eup %1888  ;;  %1902 = vrcp.f32 %v503_v40  ;;  %v431_v34 = vsel %vm429_vm9, %v430_v42, %v428_v60  ;;  %v421_v4 = vsel %vm420_vm10, %v2595_v19, %v419_v50  ;;  %v437_v19 = vand.u32 2147483648, %v2627_v63  ;;  %v2713_v50 = vld [vmem:[#allocation6 + $0x78] sm:$0xff] }
  0xcd   :  { %v1891_v52 = vpop.eup %1890  ;;  %v507_v24 = vmax.f32 %v431_v34, 0.0001  ;;  %v424_v27 = vsel %vm422_vm11, %v423_v20, %v421_v4  ;;  %v440_v0 = vmul.f32 %v1889_v29, %v2625_v36  ;;  %1180 = vadd.xlane.f32.xlu1 %v2610_v30  ;;  %1378 = vadd.xlane.f32.xlu0 %v2613_v31  ;;  %1904 = vrsqrt.f32 %v2670_v25  ;;  %v2695_v42 = vpop.xlane.xlu1 %384  ;;  %v2702_v20 = vld [vmem:[#allocation6 + $0x68] sm:$0xff] }
  0xce   :  { %v2697_v23 = vpop.xlane.xlu0 %382  ;;  %v506_v39 = vmax.f32 %v424_v27, 0.0001  ;;  %v433_v26 = vmul.f32 %v1891_v52, %v2627_v63  ;;  %1906 = vrsqrt.f32 %v2672_v59  ;;  %v1161_v40 = vmul.f32 %v2693_v16, %v2693_v16 }
  0xcf   :  { %v442_v30 = vsel %vm441_vm12, %v2625_v36, %v440_v0  ;;  %1908 = vrcp.f32 %v507_v24  ;;  %v1364_v29 = vmul.f32 %v2560_v44, %v2488_v58  ;;  %v1163_v34 = vmul.f32 %v2702_v20, %v2702_v20 }
  0xd0   :  { %v1893_v31 = vpop.eup %1892  ;;  %v435_v55 = vsel %vm434_vm14, %v2627_v63, %v433_v26  ;;  %v445_v60 = vsel %vm443_vm13, %v444_v28, %v442_v30  ;;  %1910 = vrsqrt.f32 %v2695_v42  ;;  %v2737_v44 = vmul.f32 %v2713_v50, %v2713_v50 }
  0xd1   :  { %1184 = vadd.xlane.f32.xlu1 %v2617_v35  ;;  %1382 = vadd.xlane.f32.xlu0 %v2620_v47  ;;  %v2724_v4 = vpop.xlane.xlu1 %388  ;;  %v1895_v24 = vpop.eup %1894  ;;  %1912 = vrcp.f32 %v506_v39  ;;  %v438_v36 = vsel %vm436_vm15, %v437_v19, %v435_v55  ;;  %v454_v35 = vmul.f32 %v1893_v31, %v2647_v51  ;;  %v1366_v47 = vmul.f32 %v2564_v48, %v2399_v33 }
  0xd2   :  { %v2726_v52 = vpop.xlane.xlu0 %386  ;;  %v1897_v58 = vpop.eup %1896  ;;  %v2741_v28 = vmul.f32 %v2570_v56, %v2427_v41  ;;  %v509_v27 = vmax.f32 %v445_v60, 0.0001  ;;  %v458_v0 = vand.u32 2147483648, %v2647_v51  ;;  %v508_v48 = vmax.f32 %v438_v36, 0.0001 }
  0xd3   :  { %v1899_v63 = vpop.eup %1898  ;;  %v447_v39 = vmul.f32 %v1897_v58, %v2649_v43  ;;  %v451_v26 = vand.u32 2147483648, %v2649_v43  ;;  %1914 = vrsqrt.f32 %v2697_v23  ;;  %v456_v30 = vsel %vm455_vm0, %v2647_v51, %v454_v35 }
  0xd4   :  { %v472_v31 = vand.u32 2147483648, %v2670_v25  ;;  %1916 = vrsqrt.f32 %v2724_v4  ;;  %v566_v60 = vmul.f32 %v1899_v63, %v2342_v2  ;;  %v568_v21 = vmul.f32 %v1895_v24, %v2340_v1 }
  0xd5   :  { %v1901_v33 = vpop.eup %1900  ;;  %1188 = vadd.xlane.f32.xlu1 %v1161_v40  ;;  %1386 = vadd.xlane.f32.xlu0 %v1364_v29  ;;  %v2751_v56 = vpop.xlane.xlu1 %166  ;;  %v449_v40 = vsel %vm448_vm2, %v2649_v43, %v447_v39  ;;  %1918 = vrcp.f32 %v509_v27  ;;  %v459_v22 = vsel %vm457_vm1, %v458_v0, %v456_v30  ;;  %vm471_vm6 = vcmp.eq.f32.partialorder %v2670_v25, 0.0 }
  0xd6   :  { %v2749_v41 = vpop.xlane.xlu0 %150  ;;  %v1903_v19 = vpop.eup %1902  ;;  %v569_v36 = vmul.f32 %v1901_v33, %v2344_v3  ;;  %1920 = vrcp.f32 %v508_v48  ;;  %v452_v27 = vsel %vm450_vm3, %v451_v26, %v449_v40  ;;  %v511_v0 = vmax.f32 %v459_v22, 0.0001 }
  0xd7   :  { %v1905_v55 = vpop.eup %1904  ;;  %v567_v29 = vmul.f32 %v1903_v19, %v2350_v6  ;;  %1922 = vrsqrt.f32 %v2726_v52  ;;  %vm464_vm7 = vcmp.eq.f32.partialorder %v2672_v59, 0.0  ;;  %v510_v33 = vmax.f32 %v452_v27, 0.0001 }
  0xd8   :  { %v1907_v58 = vpop.eup %1906  ;;  %v468_v35 = vmul.f32 %v1905_v55, %v2670_v25  ;;  %v1824_v24 = vpack.c.bf16 %v569_v36, %v568_v21  ;;  %v1370_v21 = vmul.f32 %v2580_v5, %v2455_v49  ;;  %vm483_vm8 = vcmp.eq.f32.partialorder %v2695_v42, inf }
  0xd9   :  { %v461_v39 = vmul.f32 %v1907_v58, %v2672_v59  ;;  %1192 = vadd.xlane.f32.xlu1 %v1163_v34  ;;  %1390 = vadd.xlane.f32.xlu0 %v1366_v47  ;;  %v1820_v2 = vpack.c.bf16 %v567_v29, %v566_v60  ;;  %v2773_v3 = vpop.xlane.xlu1 %168  ;;  %v1909_v63 = vpop.eup %1908  ;;  %v465_v34 = vand.u32 2147483648, %v2672_v59  ;;  %vm485_vm9 = vcmp.eq.f32.partialorder %v2695_v42, 0.0 }
  0xda   :  { %v2771_v6 = vpop.xlane.xlu0 %152  ;;  %v470_v1 = vsel %vm469_vm4, %v2670_v25, %v468_v35  ;;  %v1911_v51 = vpop.eup %1910  ;;  %v1359_v25 = vmul.f32 %v2556_v32, %v2418_v38  ;;  %v1361_v22 = vmul.f32 %v2582_v7, %v2446_v46  ;;  %v1372_v38 = vmul.f32 %v2585_v8, %v2483_v57 }
  0xdb   :  { %1821 = vmatprep.subr.bf16.mxu0 %v1820_v2  ;;  %1852 = vmatprep.subr.bf16.mxu1 %v1820_v2  ;;  %v1913_v47 = vpop.eup %1912  ;;  %v463_v43 = vsel %vm462_vm5, %v2672_v59, %v461_v39  ;;  %v473_v48 = vsel %vm471_vm6, %v472_v31, %v470_v1  ;;  %v482_v26 = vmul.f32 %v1911_v51, %v2695_v42  ;;  %v486_v5 = vand.u32 2147483648, %v2695_v42 }
  0xdc   :  { %1823 = vmatpush3.bf16.xpose.msra.mxu0 %v1820_v2  ;;  %1860 = vmatpush3.bf16.xpose.msra.mxu1 %v1820_v2  ;;  %v466_v49 = vsel %vm464_vm7, %v465_v34, %v463_v43  ;;  %v570_v30 = vmul.f32 %v1913_v47, %v2358_v10  ;;  %1924 = vrcp.f32 %v511_v0  ;;  %v513_v46 = vmax.f32 %v473_v48, 0.0001 }
  0xdd   :  { %1825 = vmatprep.subr.bf16.mxu0 %v1824_v24  ;;  %1853 = vmatprep.subr.bf16.mxu1 %v1824_v24  ;;  %v2800_v32 = vpop.xlane.xlu1 %170  ;;  %v1915_v19 = vpop.eup %1914  ;;  %vm476_vm10 = vcmp.eq.f32.partialorder %v2697_v23, inf  ;;  %1926 = vrcp.f32 %v510_v33  ;;  %v484_v57 = vsel %vm483_vm8, %v2695_v42, %v482_v26  ;;  %vm497_vm11 = vcmp.eq.f32.partialorder %v2724_v4, inf }
  0xde   :  { %1196 = vadd.xlane.f32.xlu1 %v2737_v44  ;;  %1394 = vadd.xlane.f32.xlu0 %v2741_v28  ;;  %v571_v44 = vmul.f32 %v1909_v63, %v2356_v9  ;;  %v2807_v31 = vpop.xlane.xlu0 %154  ;;  %v1917_v28 = vpop.eup %1916  ;;  %v475_v7 = vmul.f32 %v1915_v19, %v2697_v23  ;;  %v512_v9 = vmax.f32 %v466_v49, 0.0001  ;;  %vm478_vm12 = vcmp.eq.f32.partialorder %v2697_v23, 0.0 }
  0xdf   :  { %v496_v8 = vmul.f32 %v1917_v28, %v2724_v4  ;;  %v1919_v10 = vpop.eup %1918  ;;  %v479_v59 = vand.u32 2147483648, %v2697_v23  ;;  %1928 = vrsqrt.f32 %v2771_v6  ;;  %v500_v60 = vand.u32 2147483648, %v2724_v4 }
  0xe0   :  { %v1921_v55 = vpop.eup %1920  ;;  %v477_v40 = vsel %vm476_vm10, %v2697_v23, %v475_v7  ;;  %v1828_v29 = vpack.c.bf16 %v571_v44, %v570_v30  ;;  %1930 = vrsqrt.f32 %v2749_v41  ;;  %v487_v58 = vsel %vm485_vm9, %v486_v5, %v484_v57 }
  0xe1   :  { %v1923_v36 = vpop.eup %1922  ;;  %1932 = vrcp.f32 %v513_v46  ;;  %v498_v35 = vsel %vm497_vm11, %v2724_v4, %v496_v8  ;;  %vm499_vm13 = vcmp.eq.f32.partialorder %v2724_v4, 0.0  ;;  %v2828_v39 = vpop.xlane.xlu1 %172  ;;  %v480_v42 = vsel %vm478_vm12, %v479_v59, %v477_v40 }
  0xe2   :  { %1376 = vadd.xlane.f32.xlu1 %v1359_v25  ;;  %1398 = vadd.xlane.f32.xlu0 %v1370_v21  ;;  %1934 = vrsqrt.f32 %v2800_v32  ;;  %v2831_v2 = vpop.xlane.xlu0 %156  ;;  %v1363_v63 = vmul.f32 %v2587_v11, %v2474_v54  ;;  %v572_v27 = vmul.f32 %v1921_v55, %v2366_v14  ;;  %v515_v4 = vmax.f32 %v487_v58, 0.0001 }
  0xe3   :  { %1936 = vrcp.f32 %v512_v9  ;;  %v501_v1 = vsel %vm499_vm13, %v500_v60, %v498_v35  ;;  %v489_v51 = vmul.f32 %v1923_v36, %v2726_v52  ;;  %v573_v34 = vmul.f32 %v1919_v10, %v2364_v13 }
  0xe4   :  { %1827 = vmatpush3.bf16.xpose.msra.mxu0 %v1824_v24  ;;  %1861 = vmatpush3.bf16.xpose.msra.mxu1 %v1824_v24  ;;  %vm490_vm14 = vcmp.eq.f32.partialorder %v2726_v52, inf  ;;  %1938 = vrsqrt.f32 %v2807_v31  ;;  %v514_v24 = vmax.f32 %v480_v42, 0.0001  ;;  %v517_v47 = vmax.f32 %v501_v1, 0.0001 }
  0xe5   :  { %1829 = vmatprep.subr.bf16.mxu0 %v1828_v29  ;;  %1854 = vmatprep.subr.bf16.mxu1 %v1828_v29  ;;  %1940 = vrsqrt.f32 %v2751_v56  ;;  %v493_v0 = vand.u32 2147483648, %v2726_v52  ;;  %v1365_v14 = vmul.f32 %v2589_v12, %v2502_v62  ;;  %v2847_v54 = vpop.xlane.xlu1 %174  ;;  %v491_v11 = vsel %vm490_vm14, %v2726_v52, %v489_v51 }
  0xe6   :  { %1380 = vadd.xlane.f32.xlu1 %v1361_v22  ;;  %1402 = vadd.xlane.f32.xlu0 %v1372_v38  ;;  %v1925_v23 = vpop.eup %1924  ;;  %1942 = vrsqrt.f32 %v2773_v3  ;;  %vm492_vm15 = vcmp.eq.f32.partialorder %v2726_v52, 0.0  ;;  %v1832_v43 = vpack.c.bf16 %v573_v34, %v572_v27  ;;  %v2851_v25 = vpop.xlane.xlu0 %158  ;;  %v1367_v48 = vmul.f32 %v2591_v15, %v2413_v37 }
  0xe7   :  { %v1927_v13 = vpop.eup %1926  ;;  %1944 = vrcp.f32 %v515_v4  ;;  %v1369_v62 = vmul.f32 %v2693_v16, %v2441_v45  ;;  %v2860_v12 = vmul.f32 %v2702_v20, %v2469_v53  ;;  %vm184_vm0 = vcmp.eq.f32.partialorder %v2749_v41, inf  ;;  %v3900_v4 = vld [vmem:[#allocation10_spill] sm:$0xff] }
  0xe8   :  { %1946 = vrsqrt.f32 %v2828_v39  ;;  %v187_v21 = vand.u32 2147483648, %v2749_v41  ;;  %v2866_v37 = vmul.f32 %v2713_v50, %v2497_v61  ;;  %v494_v45 = vsel %vm492_vm15, %v493_v0, %v491_v11 }
  0xe9   :  { %v1929_v33 = vpop.eup %1928  ;;  %1948 = vrcp.f32 %v514_v24  ;;  %v243_v53 = vand.u32 2147483648, %v2751_v56  ;;  %vm191_vm1 = vcmp.eq.f32.partialorder %v2771_v6, inf  ;;  %v574_v22 = vmul.f32 %v1927_v13, %v2374_v18  ;;  %v2880_v19 = vpop.xlane.xlu1 %176 }
  0xea   :  { %1384 = vadd.xlane.f32.xlu1 %v1363_v63  ;;  %v1931_v26 = vpop.eup %1930  ;;  %1950 = vrcp.f32 %v517_v47  ;;  %v190_v20 = vmul.f32 %v1929_v33, %v2771_v6  ;;  %v575_v38 = vmul.f32 %v1925_v23, %v2372_v17  ;;  %vm193_vm2 = vcmp.eq.f32.partialorder %v2771_v6, 0.0  ;;  %v2885_v17 = vpop.xlane.xlu0 %160  ;;  %v3899_v63 = vld [vmem:[#allocation11_spill] sm:$0xff] }
  0xeb   :  { %v1933_v15 = vpop.eup %1932  ;;  %1952 = vrsqrt.f32 %v2831_v2  ;;  %v183_v50 = vmul.f32 %v1931_v26, %v2749_v41  ;;  %v194_v52 = vand.u32 2147483648, %v2771_v6  ;;  %v516_v49 = vmax.f32 %v494_v45, 0.0001 }
  0xec   :  { %1831 = vmatpush3.bf16.xpose.msra.mxu0 %v1828_v29  ;;  %1862 = vmatpush3.bf16.xpose.msra.mxu1 %v1828_v29  ;;  %v1935_v16 = vpop.eup %1934  ;;  %1954 = vrsqrt.f32 %v2847_v54  ;;  %vm247_vm3 = vcmp.eq.f32.partialorder %v2773_v3, inf  ;;  %v250_v18 = vand.u32 2147483648, %v2773_v3  ;;  %vm254_vm4 = vcmp.eq.f32.partialorder %v2800_v32, inf }
  0xed   :  { %1833 = vmatprep.subr.bf16.mxu0 %v1832_v43  ;;  %1855 = vmatprep.subr.bf16.mxu1 %v1832_v43  ;;  %v1937_v61 = vpop.eup %1936  ;;  %1956 = vrsqrt.f32 %v2851_v25  ;;  %v253_v30 = vmul.f32 %v1935_v16, %v2800_v32  ;;  %vm256_vm5 = vcmp.eq.f32.partialorder %v2800_v32, 0.0  ;;  %v192_v28 = vsel %vm191_vm1, %v2771_v6, %v190_v20  ;;  %v2918_v58 = vpop.xlane.xlu1 %178 }
  0xee   :  { %1388 = vadd.xlane.f32.xlu1 %v1365_v14  ;;  %v1939_v5 = vpop.eup %1938  ;;  %1958 = vrsqrt.f32 %v2880_v19  ;;  %v257_v46 = vand.u32 2147483648, %v2800_v32  ;;  %vm198_vm6 = vcmp.eq.f32.partialorder %v2807_v31, inf  ;;  %v1836_v7 = vpack.c.bf16 %v575_v38, %v574_v22  ;;  %v2924_v6 = vpop.xlane.xlu0 %162 }
  0xef   :  { %v1941_v44 = vpop.eup %1940  ;;  %v2899_v8 = vsel %vm184_vm0, %v2749_v41, %v183_v50  ;;  %v197_v10 = vmul.f32 %v1939_v5, %v2807_v31  ;;  %vm200_vm7 = vcmp.eq.f32.partialorder %v2807_v31, 0.0  ;;  %v201_v9 = vand.u32 2147483648, %v2807_v31  ;;  %v3901_v5 = vld [vmem:[#allocation13_spill] sm:$0xff] }
  0xf0   :  { %v1943_v57 = vpop.eup %1942  ;;  %1960 = vrcp.f32 %v516_v49  ;;  %vm261_vm8 = vcmp.eq.f32.partialorder %v2828_v39, inf  ;;  %vm263_vm9 = vcmp.eq.f32.partialorder %v2828_v39, 0.0  ;;  %v264_v55 = vand.u32 2147483648, %v2828_v39 }
  0xf1   :  { %v2904_v59 = vpop.eup %1944  ;;  %v2910_v60 = vmul.f32 %v1941_v44, %v2751_v56  ;;  %v195_v29 = vsel %vm193_vm2, %v194_v52, %v192_v28  ;;  %v255_v36 = vsel %vm254_vm4, %v2800_v32, %v253_v30  ;;  %vm205_vm10 = vcmp.eq.f32.partialorder %v2831_v2, inf  ;;  %v2958_v45 = vpop.xlane.xlu1 %180  ;;  %v3902_v44 = vld [vmem:[#allocation12_spill] sm:$0xff] }
  0xf2   :  { %1392 = vadd.xlane.f32.xlu1 %v1367_v48  ;;  %v1947_v40 = vpop.eup %1946  ;;  %v246_v42 = vmul.f32 %v1943_v57, %v2773_v3  ;;  %v576_v27 = vmul.f32 %v1937_v61, %v3899_v63  ;;  %v577_v1 = vmul.f32 %v1933_v15, %v3900_v4  ;;  %1962 = vrsqrt.f32 %v2885_v17  ;;  %v2969_v50 = vpop.xlane.xlu0 %164 }
  0xf3   :  { %v1949_v35 = vpop.eup %1948  ;;  %vm186_vm11 = vcmp.eq.f32.partialorder %v2749_v41, 0.0  ;;  %v199_v34 = vsel %vm198_vm6, %v2807_v31, %v197_v10  ;;  %v208_v24 = vand.u32 2147483648, %v2831_v2  ;;  %vm268_vm12 = vcmp.eq.f32.partialorder %v2847_v54, inf }
  0xf4   :  { %1835 = vmatpush3.bf16.xpose.msra.mxu0 %v1832_v43  ;;  %1863 = vmatpush3.bf16.xpose.msra.mxu1 %v1832_v43  ;;  %v2926_v51 = vpop.eup %1950  ;;  %1964 = vrsqrt.f32 %v2924_v6  ;;  %vm240_vm13 = vcmp.eq.f32.partialorder %v2751_v56, inf  ;;  %v295_v47 = vmax.f32 %v195_v29, 0.0001  ;;  %v258_v0 = vsel %vm256_vm5, %v257_v46, %v255_v36 }
  0xf5   :  { %1837 = vmatprep.subr.bf16.mxu0 %v1836_v7  ;;  %1856 = vmatprep.subr.bf16.mxu1 %v1836_v7  ;;  %v1953_v23 = vpop.eup %1952  ;;  %v260_v14 = vmul.f32 %v1947_v40, %v2828_v39  ;;  %vm207_vm14 = vcmp.eq.f32.partialorder %v2831_v2, 0.0  ;;  %1966 = vrsqrt.f32 %v2918_v58  ;;  %vm270_vm15 = vcmp.eq.f32.partialorder %v2847_v54, 0.0 }
  0xf6   :  { %1396 = vadd.xlane.f32.xlu1 %v1369_v62  ;;  %v1955_v13 = vpop.eup %1954  ;;  %v271_v11 = vand.u32 2147483648, %v2847_v54  ;;  %vm212_vm0 = vcmp.eq.f32.partialorder %v2851_v25, inf  ;;  %vm214_vm1 = vcmp.eq.f32.partialorder %v2851_v25, 0.0  ;;  %v2949_v32 = vsel %vm247_vm3, %v2773_v3, %v246_v42 }
  0xf7   :  { %v1957_v43 = vpop.eup %1956  ;;  %vm249_vm2 = vcmp.eq.f32.partialorder %v2773_v3, 0.0  ;;  %v202_v33 = vsel %vm200_vm7, %v201_v9, %v199_v34  ;;  %v215_v48 = vand.u32 2147483648, %v2851_v25  ;;  %v1840_v62 = vpack.c.bf16 %v577_v1, %v576_v27  ;;  %v2196_v34 = vld [vmem:[#allocation4 + $0x70] sm:$0xff] }
  0xf8   :  { %v304_v26 = vmax.f32 %v258_v0, 0.0001  ;;  %vm275_vm4 = vcmp.eq.f32.partialorder %v2880_v19, inf  ;;  %vm277_vm5 = vcmp.eq.f32.partialorder %v2880_v19, 0.0  ;;  %v278_v15 = vand.u32 2147483648, %v2880_v19 }
  0xf9   :  { %1968 = vrcp.f32 %v295_v47  ;;  %v262_v31 = vsel %vm261_vm8, %v2828_v39, %v260_v14  ;;  %v204_v16 = vmul.f32 %v1953_v23, %v2831_v2  ;;  %v296_v20 = vmax.f32 %v202_v33, 0.0001  ;;  %v2197_v23 = vld [vmem:[#allocation4 + $0x78] sm:$0xff] }
  0xfa   :  { %1400 = vadd.xlane.f32.xlu1 %v2860_v12  ;;  %v1959_v12 = vpop.eup %1958  ;;  %v267_v22 = vmul.f32 %v1955_v13, %v2847_v54  ;;  %v211_v38 = vmul.f32 %v1957_v43, %v2851_v25  ;;  %v222_v61 = vand.u32 2147483648, %v2885_v17  ;;  %v578_v30 = vmul.f32 %v1949_v35, %v3901_v5 }
  0xfb   :  { %v1961_v52 = vpop.eup %1960  ;;  %v274_v49 = vmul.f32 %v1959_v12, %v2880_v19  ;;  %v579_v28 = vmul.f32 %v2904_v59, %v3902_v44  ;;  %1970 = vrsqrt.f32 %v2958_v45  ;;  %vm221_vm6 = vcmp.eq.f32.partialorder %v2885_v17, 0.0 }
  0xfc   :  { %1839 = vmatpush3.bf16.xpose.msra.mxu0 %v1836_v7  ;;  %1864 = vmatpush3.bf16.xpose.msra.mxu1 %v1836_v7  ;;  %1972 = vrcp.f32 %v304_v26  ;;  %vm282_vm7 = vcmp.eq.f32.partialorder %v2918_v58, inf  ;;  %v285_v46 = vand.u32 2147483648, %v2918_v58  ;;  %v1963_v7 = vpop.eup %1962  ;;  %v206_v57 = vsel %vm205_vm10, %v2831_v2, %v204_v16 }
  0xfd   :  { %1841 = vmatprep.subr.bf16.mxu0 %v1840_v62  ;;  %1857 = vmatprep.subr.bf16.mxu1 %v1840_v62  ;;  %vm226_vm8 = vcmp.eq.f32.partialorder %v2924_v6, inf  ;;  %vm228_vm3 = vcmp.eq.f32.partialorder %v2924_v6, 0.0  ;;  %1974 = vrsqrt.f32 %v2969_v50  ;;  %v269_v39 = vsel %vm268_vm12, %v2847_v54, %v267_v22 }
  0xfe   :  { %1404 = vadd.xlane.f32.xlu1 %v2866_v37  ;;  %v265_v37 = vsel %vm263_vm9, %v264_v55, %v262_v31  ;;  %v1965_v10 = vpop.eup %1964  ;;  %1976 = vrcp.f32 %v296_v20  ;;  %v213_v9 = vsel %vm212_vm0, %v2851_v25, %v211_v38  ;;  %vm284_vm9 = vcmp.eq.f32.partialorder %v2918_v58, 0.0 }
  0xff   :  { %v229_v59 = vand.u32 2147483648, %v2924_v6  ;;  %v1967_v55 = vpop.eup %1966  ;;  %v305_v40 = vmax.f32 %v265_v37, 0.0001  ;;  %v276_v29 = vsel %vm275_vm4, %v2880_v19, %v274_v49  ;;  %v1844_v36 = vpack.c.bf16 %v579_v28, %v578_v30  ;;  %v2198_v30 = vld [vmem:[%s3884_s0] sm:$0xff] }
 0x100   :  { %v188_v35 = vsel %vm186_vm11, %v187_v21, %v2899_v8  ;;  %v209_v42 = vsel %vm207_vm14, %v208_v24, %v206_v57  ;;  %v218_v63 = vmul.f32 %v1963_v7, %v2885_v17  ;;  %v241_v4 = vsel %vm240_vm13, %v2751_v56, %v2910_v60  ;;  %v2199_v37 = vld [vmem:[%s3884_s0 + $0x40] sm:$0xff] }
 0x101   :  { %v294_v27 = vmax.f32 %v188_v35, 0.0001  ;;  %v272_v1 = vsel %vm270_vm15, %v271_v11, %v269_v39  ;;  %v216_v41 = vsel %vm214_vm1, %v215_v48, %v213_v9  ;;  %v225_v21 = vmul.f32 %v1965_v10, %v2924_v6  ;;  %v2200_v39 = vld [vmem:[%s3884_s0 + $0x8] sm:$0xff]  ;;  %v2203_v35 = vld [vmem:[%s3884_s0 + $0x10] sm:$0xff] }
 0x102   :  { %vm242_vm10 = vcmp.eq.f32.partialorder %v2751_v56, 0.0  ;;  %v279_v2 = vsel %vm277_vm5, %v278_v15, %v276_v29  ;;  %v281_v8 = vmul.f32 %v1967_v55, %v2918_v58  ;;  %v251_v54 = vsel %vm249_vm2, %v250_v18, %v2949_v32  ;;  %v2202_v29 = vld [vmem:[%s3884_s0 + $0x48] sm:$0xff] }
 0x103   :  { %v244_v60 = vsel %vm242_vm10, %v243_v53, %v241_v4  ;;  %v3030_v25 = vpop.eup %1968  ;;  %1978 = vrcp.f32 %v294_v27  ;;  %v580_v24 = vmul.f32 %v2196_v34, %v1961_v52  ;;  %v581_v19 = vmul.f32 %v2197_v23, %v2926_v51  ;;  %v2204_v27 = vld [vmem:[%s3884_s0 + $0x18] sm:$0xff]  ;;  %v2208_v23 = vld [vmem:[%s3884_s0 + $0x28] sm:$0xff] }
 0x104   :  { %1843 = vmatpush3.bf16.xpose.msra.mxu0 %v1840_v62  ;;  %1865 = vmatpush3.bf16.xpose.msra.mxu1 %v1840_v62  ;;  %v302_v47 = vmax.f32 %v244_v60, 0.0001  ;;  %1980 = vrcp.f32 %v305_v40  ;;  %v297_v0 = vmax.f32 %v209_v42, 0.0001  ;;  %v306_v14 = vmax.f32 %v272_v1, 0.0001 }
 0x105   :  { %1845 = vmatprep.subr.bf16.mxu0 %v1844_v36  ;;  %1858 = vmatprep.subr.bf16.mxu1 %v1844_v36  ;;  %vm3903_vm11 = vcmp.eq.f32.partialorder %v2885_v17, inf  ;;  %v1971_v53 = vpop.eup %1970  ;;  %v298_v13 = vmax.f32 %v216_v41, 0.0001  ;;  %v227_v3 = vsel %vm226_vm8, %v2924_v6, %v225_v21  ;;  %v303_v18 = vmax.f32 %v251_v54, 0.0001  ;;  %v2205_v41 = vld [vmem:[%s3884_s0 + $0x58] sm:$0xff] }
 0x106   :  { %v220_v56 = vsel %vm3903_vm11, %v2885_v17, %v218_v63  ;;  %1982 = vrcp.f32 %v302_v47  ;;  %v3039_v11 = vpop.eup %1972  ;;  %v307_v43 = vmax.f32 %v279_v2, 0.0001  ;;  %v283_v51 = vsel %vm282_vm7, %v2918_v58, %v281_v8  ;;  %v2206_v2 = vld [vmem:[%s3884_s0 + $0x20] sm:$0xff] }
 0x107   :  { %v288_v32 = vmul.f32 %v1971_v53, %v2958_v45  ;;  %vm289_vm12 = vcmp.eq.f32.partialorder %v2958_v45, inf  ;;  %v1975_v33 = vpop.eup %1974  ;;  %v223_v48 = vsel %vm221_vm6, %v222_v61, %v220_v56  ;;  %vm233_vm13 = vcmp.eq.f32.partialorder %v2969_v50, inf  ;;  %v2207_v54 = vld [vmem:[%s3884_s0 + $0x60] sm:$0xff]  ;;  %v2210_v56 = vld [vmem:[%s3884_s0 + $0x30] sm:$0xff] }
 0x108   :  { %v236_v62 = vand.u32 2147483648, %v2969_v50  ;;  %v1848_v12 = vpack.c.bf16 %v581_v19, %v580_v24  ;;  %v3052_v26 = vpop.eup %1976  ;;  %v230_v15 = vsel %vm228_vm3, %v229_v59, %v227_v3  ;;  %v292_v31 = vand.u32 2147483648, %v2958_v45  ;;  %v2201_v59 = vld [vmem:[%s3884_s0 + $0x50] sm:$0xff] }
 0x109   :  { %v232_v16 = vmul.f32 %v1975_v33, %v2969_v50  ;;  %vm235_vm14 = vcmp.eq.f32.partialorder %v2969_v50, 0.0  ;;  %v286_v17 = vsel %vm284_vm9, %v285_v46, %v283_v51  ;;  %v290_v20 = vsel %vm289_vm12, %v2958_v45, %v288_v32  ;;  %v2211_v3 = vld [vmem:[%s3884_s0 + $0x70] sm:$0xff]  ;;  %v2213_v32 = vld [vmem:[%s3884_s0 + $0x78] sm:$0xff] }
 0x10a   :  { %vm291_vm15 = vcmp.eq.f32.partialorder %v2958_v45, 0.0  ;;  %1984 = vrcp.f32 %v303_v18  ;;  %v299_v6 = vmax.f32 %v223_v48, 0.0001  ;;  %v300_v38 = vmax.f32 %v230_v15, 0.0001 }
 0x10b   :  { %1986 = vrcp.f32 %v297_v0  ;;  %v234_v22 = vsel %vm233_vm13, %v2969_v50, %v232_v16  ;;  %v308_v52 = vmax.f32 %v286_v17, 0.0001  ;;  %v293_v58 = vsel %vm291_vm15, %v292_v31, %v290_v20  ;;  %v2209_v0 = vld [vmem:[%s3884_s0 + $0x68] sm:$0xff]  ;;  %v3195_v15 = vld [vmem:[%s3888_s4] sm:$0x1] }
 0x10c   :  { %1847 = vmatpush3.bf16.xpose.msra.mxu0 %v1844_v36  ;;  %1866 = vmatpush3.bf16.xpose.msra.mxu1 %v1844_v36  ;;  %1988 = vrcp.f32 %v298_v13  ;;  %v237_v61 = vsel %vm235_vm14, %v236_v62, %v234_v22  ;;  %v309_v28 = vmax.f32 %v293_v58, 0.0001  ;;  %v551_v9 = vmul.f32 %v2200_v39, %v3030_v25  ;;  %v3190_v62 = vpop.permute.xlu1 %890 }
 0x10d   :  { %1849 = vmatprep.subr.bf16.mxu0 %v1848_v12  ;;  %1859 = vmatprep.subr.bf16.mxu1 %v1848_v12  ;;  %1990 = vrcp.f32 %v306_v14  ;;  %v3068_v49 = vpop.eup %1978  ;;  %v301_v45 = vmax.f32 %v237_v61, 0.0001  ;;  %v560_v55 = vmul.f32 %v2201_v59, %v3039_v11  ;;  %v552_v42 = vmul.f32 %v2203_v35, %v3052_v26 }
 0x10e   :  { %1992 = vrcp.f32 %v307_v43  ;;  %v3070_v5 = vpop.eup %1980  ;;  %v550_v44 = vmul.f32 %v2198_v30, %v3068_v49  ;;  %v2212_v43 = vld [vmem:[%s3884_s0 + $0x38] sm:$0xff]  ;;  %vm52_vm0 = vcmask 7168   ;;  %v2283_v48 = vmov 0.0  }
 0x10f   :  { %1994 = vrcp.f32 %v299_v6  ;;  %v561_v21 = vmul.f32 %v2205_v41, %v3070_v5  ;;  %70 = vst.msk [vmem:[#allocation3 + $0x8] sm:$0xff] %vm52_vm0, %v2283_v48  ;;  %53 = vst.msk [vmem:[#allocation2] sm:$0xff] %vm52_vm0, %v2283_v48  ;;  %vm847_vm1 = vcmp.ge.s32.totalorder %v3195_v15, 0  ;;  %v3904_v17 = vmov 0  }
 0x110   :  { %v3076_v50 = vpop.eup %1982  ;;  %1996 = vrcp.f32 %v300_v38  ;;  %1796 = vmatprep.mubr.f32.mxu0 %v550_v44  ;;  %54 = vst.msk [vmem:[#allocation2 + $0x8] sm:$0xff] %vm52_vm0, %v2283_v48  ;;  %55 = vst.msk [vmem:[#allocation2 + $0x10] sm:$0xff] %vm52_vm0, %v2283_v48  ;;  %v3200_v16 = vpop.permute.xlu1 %893  ;;  %v848_v20 = vsel %vm847_vm1, 1, %v3904_v17 }
 0x111   :  { %1998 = vrcp.f32 %v308_v52  ;;  %v558_v46 = vmul.f32 %v2199_v37, %v3076_v50  ;;  %56 = vst.msk [vmem:[#allocation2 + $0x18] sm:$0xff] %vm52_vm0, %v2283_v48  ;;  %57 = vst.msk [vmem:[#allocation2 + $0x20] sm:$0xff] %vm52_vm0, %v2283_v48 }
 0x112   :  { %2000 = vrcp.f32 %v301_v45  ;;  %58 = vst.msk [vmem:[#allocation2 + $0x28] sm:$0xff] %vm52_vm0, %v2283_v48  ;;  %59 = vst.msk [vmem:[#allocation2 + $0x30] sm:$0xff] %vm52_vm0, %v2283_v48 }
 0x113   :  { %1808 = vmatprep.mubr.f32.mxu1 %v558_v46  ;;  %2002 = vrcp.f32 %v309_v28  ;;  %60 = vst.msk [vmem:[#allocation2 + $0x38] sm:$0xff] %vm52_vm0, %v2283_v48  ;;  %61 = vst.msk [vmem:[#allocation2 + $0x40] sm:$0xff] %vm52_vm0, %v2283_v48 }
 0x114   :  { %1851 = vmatpush3.bf16.xpose.msra.mxu0 %v1848_v12  ;;  %1867 = vmatpush3.bf16.xpose.msra.mxu1 %v1848_v12  ;;  %v3082_v7 = vpop.eup %1984  ;;  %62 = vst.msk [vmem:[#allocation2 + $0x48] sm:$0xff] %vm52_vm0, %v2283_v48  ;;  %63 = vst.msk [vmem:[#allocation2 + $0x50] sm:$0xff] %vm52_vm0, %v2283_v48  ;;  %v792_v12 = vlaneseq  ;;  %v3208_v38 = vpop.permute.xlu1 %896 }
 0x115   :  { %v3084_v57 = vpop.eup %1986  ;;  %v559_v36 = vmul.f32 %v2202_v29, %v3082_v7  ;;  %64 = vst.msk [vmem:[#allocation2 + $0x58] sm:$0xff] %vm52_vm0, %v2283_v48  ;;  %65 = vst.msk [vmem:[#allocation2 + $0x60] sm:$0xff] %vm52_vm0, %v2283_v48 }
 0x116   :  { %v3086_v10 = vpop.eup %1988  ;;  %v553_v4 = vmul.f32 %v2204_v27, %v3084_v57  ;;  %66 = vst.msk [vmem:[#allocation2 + $0x68] sm:$0xff] %vm52_vm0, %v2283_v48  ;;  %67 = vst.msk [vmem:[#allocation2 + $0x70] sm:$0xff] %vm52_vm0, %v2283_v48  ;;  %v3197_v31 = vshrl.u32 %v792_v12, 7  ;;  %v3213_v58 = vand.u32 127, %v792_v12 }
 0x117   :  { %v3096_v40 = vpop.eup %1990  ;;  %v554_v8 = vmul.f32 %v2206_v2, %v3086_v10  ;;  %68 = vst.msk [vmem:[#allocation2 + $0x78] sm:$0xff] %vm52_vm0, %v2283_v48  ;;  %69 = vst.msk [vmem:[#allocation3] sm:$0xff] %vm52_vm0, %v2283_v48 }
 0x118   :  { %v3106_v63 = vpop.eup %1992  ;;  %v562_v34 = vmul.f32 %v2207_v54, %v3096_v40  ;;  %71 = vst.msk [vmem:[#allocation3 + $0x10] sm:$0xff] %vm52_vm0, %v2283_v48  ;;  %72 = vst.msk [vmem:[#allocation3 + $0x18] sm:$0xff] %vm52_vm0, %v2283_v48  ;;  %v851_v6 = vsub.s32 0, %v3197_v31  ;;  %v3211_v52 = vadd.s32 8, %v3197_v31  ;;  %v3216_v28 = vadd.s32 72, %v3197_v31 }
 0x119   :  { %v3112_v1 = vpop.eup %1994  ;;  %v563_v14 = vmul.f32 %v2209_v0, %v3106_v63  ;;  %73 = vst.msk [vmem:[#allocation3 + $0x20] sm:$0xff] %vm52_vm0, %v2283_v48  ;;  %74 = vst.msk [vmem:[#allocation3 + $0x28] sm:$0xff] %vm52_vm0, %v2283_v48  ;;  %v3222_v29 = vadd.s32 24, %v3197_v31  ;;  %v3234_v41 = vadd.s32 80, %v3197_v31  ;;  %vm831_vm3 = vcmp.ne.s32.totalorder %v3197_v31, %v3213_v58 }
 0x11a   :  { %v3122_v60 = vpop.eup %1996  ;;  %v555_v19 = vmul.f32 %v2208_v23, %v3112_v1  ;;  %75 = vst.msk [vmem:[#allocation3 + $0x30] sm:$0xff] %vm52_vm0, %v2283_v48  ;;  %76 = vst.msk [vmem:[#allocation3 + $0x38] sm:$0xff] %vm52_vm0, %v2283_v48  ;;  %v3206_v22 = vrot.slane %v848_v20, %v851_v6  ;;  %vm832_vm4 = vcmp.ne.s32.totalorder %v3211_v52, %v3213_v58  ;;  %v3238_v23 = vpop.permute.xlu1 %899 }
 0x11b   :  { %1797 = vmatmul.mubr.f32.vlgmr.msra.gmra.mrb[0].mxu0 %v551_v9  ;;  %1809 = vmatmul.mubr.f32.vlgmr.msra.gmra.mrb[0].mxu1 %v559_v36  ;;  %v3128_v24 = vpop.eup %1998  ;;  %v556_v53 = vmul.f32 %v2210_v56, %v3122_v60  ;;  %77 = vst.msk [vmem:[#allocation3 + $0x40] sm:$0xff] %vm52_vm0, %v2283_v48  ;;  %78 = vst.msk [vmem:[#allocation3 + $0x48] sm:$0xff] %vm52_vm0, %v2283_v48  ;;  %v3219_v9 = vadd.s32 64, %v3197_v31  ;;  %v3225_v36 = vadd.s32 16, %v3197_v31 }
 0x11c   :  { %1799 = vmatprep.mubr.f32.mxu0 %v552_v42  ;;  %1811 = vmatprep.mubr.f32.mxu1 %v560_v55  ;;  %v3134_v47 = vpop.eup %2000  ;;  %v564_v18 = vmul.f32 %v2211_v3, %v3128_v24  ;;  %79 = vst.msk [vmem:[#allocation3 + $0x50] sm:$0xff] %vm52_vm0, %v2283_v48  ;;  %80 = vst.msk [vmem:[#allocation3 + $0x58] sm:$0xff] %vm52_vm0, %v2283_v48  ;;  %vm853_vm2 = vcmp.eq.s32.totalorder %v3206_v22, 1  ;;  %vm840_vm5 = vcmp.ne.s32.totalorder %v3216_v28, %v3213_v58 }
 0x11d   :  { %v3144_v13 = vpop.eup %2002  ;;  %v557_v51 = vmul.f32 %v2212_v43, %v3134_v47  ;;  %81 = vst.msk [vmem:[#allocation3 + $0x60] sm:$0xff] %vm52_vm0, %v2283_v48  ;;  %82 = vst.msk [vmem:[#allocation3 + $0x68] sm:$0xff] %vm52_vm0, %v2283_v48  ;;  %vm839_vm6 = vcmp.ne.s32.totalorder %v3219_v9, %v3213_v58  ;;  %v3245_v43 = vadd.s32 40, %v3197_v31  ;;  %vm834_vm7 = vcmp.ne.s32.totalorder %v3222_v29, %v3213_v58 }
 0x11e   :  { %v565_v33 = vmul.f32 %v2213_v32, %v3144_v13  ;;  %83 = vst.msk [vmem:[#allocation3 + $0x70] sm:$0xff] %vm52_vm0, %v2283_v48  ;;  %84 = vst.msk [vmem:[#allocation3 + $0x78] sm:$0xff] %vm52_vm0, %v2283_v48  ;;  %vm833_vm9 = vcmp.ne.s32.totalorder %v3225_v36, %v3213_v58  ;;  %vm841_vm10 = vcmp.ne.s32.totalorder %v3234_v41, %v3213_v58  ;;  %v805_v28 = vadd.s32 96, %v3197_v31 }
 0x11f   :  { %1800 = vmatmul.mubr.f32.gmra.mrb[2].mxu0 %v553_v4  ;;  %1812 = vmatmul.mubr.f32.gmra.mrb[2].mxu1 %v561_v21  ;;  %v3231_v4 = vadd.s32 88, %v3197_v31  ;;  %vm3265_vm11 = vmand %vm832_vm4, %vm853_vm2  ;;  %vm836_vm4 = vcmp.ne.s32.totalorder %v3245_v43, %v3213_v58  ;;  %v808_v36 = vadd.s32 120, %v3197_v31  ;;  %v807_v43 = vadd.s32 112, %v3197_v31 }
 0x120   :  { %1802 = vmatprep.mubr.f32.mxu0 %v554_v8  ;;  %1814 = vmatprep.mubr.f32.mxu1 %v562_v34  ;;  %vm3274_vm12 = vmand %vm840_vm5, %vm853_vm2 }
 0x121   :  { %vm842_vm8 = vcmp.ne.s32.totalorder %v3231_v4, %v3213_v58  ;;  %vm3283_vm13 = vmand %vm831_vm3, %vm853_vm2 }
 0x122   :  { %vm3296_vm14 = vmand %vm839_vm6, %vm853_vm2 }
 0x123   :  { %1803 = vmatmul.mubr.f32.gmra.mrb[4].mxu0 %v555_v19  ;;  %1815 = vmatmul.mubr.f32.gmra.mrb[4].mxu1 %v563_v14  ;;  %vm3311_vm15 = vmand %vm834_vm7, %vm853_vm2 }
 0x124   :  { %1805 = vmatprep.mubr.f32.mxu0 %v556_v53  ;;  %1817 = vmatprep.mubr.f32.mxu1 %v564_v18  ;;  %vm3322_vm1 = vmand %vm842_vm8, %vm853_vm2 }
 0x125   :  { %vm3340_vm5 = vmand %vm833_vm9, %vm853_vm2  ;;  %vm843_vm9 = vcmp.ne.s32.totalorder %v805_v28, %v3213_v58 }
 0x126   :  { %vm3354_vm3 = vmand %vm841_vm10, %vm853_vm2 }
 0x127   :  { %1806 = vmatmul.mubr.f32.gmra.mrb[6].mxu0 %v557_v51  ;;  %1818 = vmatmul.mubr.f32.gmra.mrb[6].mxu1 %v565_v33  ;;  %vm3369_vm7 = vmand %vm836_vm4, %vm853_vm2 }
 0x1ee   :  { %v1798_v61 = vpop.f32.mrb[0].mxu0  ;;  %v1810_v30 = vpop.f32.mrb[0].mxu1 }
 0x1ef   :  { %v1701_v45 = vadd.f32 -1.0, %v1798_v61  ;;  %v648_v44 = vpop.f32.mrb[1].mxu0  ;;  %v1709_v37 = vadd.f32 -1.0, %v1810_v30  ;;  %v688_v39 = vpop.f32.mrb[1].mxu1 }
 0x1f0   :  { %v1700_v46 = vadd.f32 -1.0, %v648_v44  ;;  %v1708_v55 = vadd.f32 -1.0, %v688_v39 }
 0x1f1   :  { %v744_v59 = vmul.f32 2.0, %v1701_v45  ;;  %v752_v35 = vmul.f32 2.0, %v1709_v37 }
 0x1f2   :  { %v743_v42 = vmul.f32 2.0, %v1700_v46  ;;  %v1801_v27 = vpop.f32.mrb[2].mxu0  ;;  %v751_v2 = vmul.f32 2.0, %v1708_v55  ;;  %v1813_v54 = vpop.f32.mrb[2].mxu1 }
 0x1f3   :  { %v761_v21 = vmul.f32 1.442695, %v744_v59  ;;  %v1703_v8 = vadd.f32 -1.0, %v1801_v27  ;;  %v658_v34 = vpop.f32.mrb[3].mxu0  ;;  %v777_v19 = vmul.f32 1.442695, %v752_v35  ;;  %v3255_v55 = vpop.permute.xlu1 %902 }
 0x1f4   :  { %v759_v0 = vmul.f32 1.442695, %v743_v42  ;;  %v1711_v14 = vadd.f32 -1.0, %v1813_v54  ;;  %v1702_v56 = vadd.f32 -1.0, %v658_v34  ;;  %v775_v53 = vmul.f32 1.442695, %v751_v2 }
 0x1f5   :  { %2004 = vpow2.f32 %v761_v21  ;;  %v746_v3 = vmul.f32 2.0, %v1703_v8  ;;  %v698_v18 = vpop.f32.mrb[3].mxu1  ;;  %v3258_v21 = vadd.s32 32, %v3197_v31 }
 0x1f6   :  { %2006 = vpow2.f32 %v777_v19  ;;  %v754_v51 = vmul.f32 2.0, %v1711_v14  ;;  %v745_v32 = vmul.f32 2.0, %v1702_v56  ;;  %v1710_v33 = vadd.f32 -1.0, %v698_v18  ;;  %v1804_v48 = vpop.f32.mrb[4].mxu0  ;;  %v1816_v20 = vpop.f32.mrb[4].mxu1 }
 0x1f7   :  { %2008 = vpow2.f32 %v759_v0  ;;  %v765_v12 = vmul.f32 1.442695, %v746_v3  ;;  %v1705_v17 = vadd.f32 -1.0, %v1804_v48  ;;  %v668_v61 = vpop.f32.mrb[5].mxu0  ;;  %v708_v37 = vpop.f32.mrb[5].mxu1  ;;  %v1713_v39 = vadd.f32 -1.0, %v1816_v20 }
 0x1f8   :  { %2010 = vpow2.f32 %v775_v53  ;;  %v781_v45 = vmul.f32 1.442695, %v754_v51  ;;  %v763_v30 = vmul.f32 1.442695, %v745_v32  ;;  %v753_v44 = vmul.f32 2.0, %v1710_v33 }
 0x1f9   :  { %2012 = vpow2.f32 %v765_v12  ;;  %v748_v46 = vmul.f32 2.0, %v1705_v17  ;;  %v1704_v59 = vadd.f32 -1.0, %v668_v61  ;;  %v1712_v42 = vadd.f32 -1.0, %v708_v37  ;;  %v3289_v37 = vpop.permute.xlu1 %905 }
 0x1fa   :  { %2014 = vpow2.f32 %v781_v45  ;;  %v779_v35 = vmul.f32 1.442695, %v753_v44  ;;  %v1807_v27 = vpop.f32.mrb[6].mxu0  ;;  %v756_v8 = vmul.f32 2.0, %v1713_v39  ;;  %v1819_v34 = vpop.f32.mrb[6].mxu1  ;;  %vm835_vm8 = vcmp.ne.s32.totalorder %v3258_v21, %v3213_v58 }
 0x1fb   :  { %2016 = vpow2.f32 %v763_v30  ;;  %v769_v2 = vmul.f32 1.442695, %v748_v46  ;;  %v747_v54 = vmul.f32 2.0, %v1704_v59  ;;  %v678_v19 = vpop.f32.mrb[7].mxu0  ;;  %v755_v0 = vmul.f32 2.0, %v1712_v42  ;;  %v718_v53 = vpop.f32.mrb[7].mxu1 }
 0x1fc   :  { %2018 = vpow2.f32 %v779_v35  ;;  %v1707_v14 = vadd.f32 -1.0, %v1807_v27  ;;  %v1715_v56 = vadd.f32 -1.0, %v1819_v34  ;;  %v785_v3 = vmul.f32 1.442695, %v756_v8 }
 0x1fd   :  { %2020 = vpow2.f32 %v769_v2  ;;  %v767_v18 = vmul.f32 1.442695, %v747_v54  ;;  %v1706_v51 = vadd.f32 -1.0, %v678_v19  ;;  %v783_v33 = vmul.f32 1.442695, %v755_v0 }
 0x1fe   :  { %v750_v48 = vmul.f32 2.0, %v1707_v14  ;;  %v758_v12 = vmul.f32 2.0, %v1715_v56  ;;  %v1714_v17 = vadd.f32 -1.0, %v718_v53  ;;  %2022 = vpow2.f32 %v785_v3  ;;  %v888_v56 = vpop.permute.xlu0 %887 }
 0x1ff   :  { %v2005_v61 = vpop.eup %2004  ;;  %v749_v52 = vmul.f32 2.0, %v1706_v51  ;;  %v806_v30 = vadd.s32 104, %v3197_v31  ;;  %2024 = vpow2.f32 %v767_v18  ;;  %v3331_v14 = vrot.slane %v3195_v15, %v851_v6 }
 0x200   :  { %v2007_v44 = vpop.eup %2006  ;;  %v773_v46 = vmul.f32 1.442695, %v750_v48  ;;  %v789_v39 = vmul.f32 1.442695, %v758_v12  ;;  %v757_v59 = vmul.f32 2.0, %v1714_v17  ;;  %2026 = vpow2.f32 %v783_v33  ;;  %v3376_v12 = vpop.permute.xlu1 %908 }
 0x201   :  { %v2009_v42 = vpop.eup %2008  ;;  %v771_v27 = vmul.f32 1.442695, %v749_v52  ;;  %v871_v2 = vsel %vm3265_vm11, %v2005_v61, 0.0  ;;  %v3304_v8 = vsel %vm3274_vm12, %v2007_v44, 0.0  ;;  %v800_v3 = vadd.s32 56, %v3197_v31 }
 0x202   :  { %v2011_v54 = vpop.eup %2010  ;;  %2028 = vpow2.f32 %v773_v46  ;;  %v787_v34 = vmul.f32 1.442695, %v757_v59  ;;  %972 = vadd.xlane.f32.xlu1 %v871_v2  ;;  %v870_v19 = vsel %vm3283_vm13, %v2009_v42, 0.0  ;;  %vm844_vm6 = vcmp.ne.s32.totalorder %v806_v30, %v3213_v58  ;;  %v915_v30 = vpop.permute.xlu0 %914 }
 0x203   :  { %v2013_v29 = vpop.eup %2012  ;;  %2030 = vpow2.f32 %v789_v39  ;;  %970 = vadd.xlane.f32.xlu0 %v870_v19  ;;  %v878_v53 = vsel %vm3296_vm14, %v2011_v54, 0.0  ;;  %v799_v33 = vadd.s32 48, %v3197_v31  ;;  %vm938_vm10 = vcmp.eq.s32.totalorder %v888_v56, %v3331_v14  ;;  %vm867_vm11 = vmand %vm844_vm6, %vm853_vm2 }
 0x204   :  { %v2015_v18 = vpop.eup %2014  ;;  %2032 = vpow2.f32 %v771_v27  ;;  %v3347_v15 = vsel %vm3311_vm15, %v2013_v29, 0.0  ;;  %vm838_vm12 = vcmp.ne.s32.totalorder %v800_v3, %v3213_v58  ;;  %vm939_vm13 = vcmp.eq.s32.totalorder %v3190_v62, %v3331_v14  ;;  %vm3400_vm14 = vmand %vm835_vm8, %vm853_vm2  ;;  %v912_v35 = vpop.permute.xlu1 %911 }
 0x205   :  { %v2017_v51 = vpop.eup %2016  ;;  %2034 = vpow2.f32 %v787_v34  ;;  %v3362_v32 = vsel %vm3322_vm1, %v2015_v18, 0.0  ;;  %vm846_vm15 = vcmp.ne.s32.totalorder %v808_v36, %v3213_v58  ;;  %v1052_v44 = vsel %vm939_vm13, %v871_v2, 0.0  ;;  %vm866_vm1 = vmand %vm843_vm9, %vm853_vm2 }
 0x206   :  { %v2019_v48 = vpop.eup %2018  ;;  %988 = vadd.xlane.f32.xlu1 %v3304_v8  ;;  %v872_v17 = vsel %vm3340_vm5, %v2017_v51, 0.0  ;;  %vm837_vm4 = vcmp.ne.s32.totalorder %v799_v33, %v3213_v58  ;;  %vm947_vm5 = vcmp.eq.s32.totalorder %v915_v30, %v3331_v14  ;;  %v1051_v21 = vsel %vm938_vm10, %v870_v19, 0.0  ;;  %v921_v22 = vpop.permute.xlu0 %920 }
 0x207   :  { %v2021_v20 = vpop.eup %2020  ;;  %986 = vadd.xlane.f32.xlu0 %v878_v53  ;;  %v880_v61 = vsel %vm3354_vm3, %v2019_v48, 0.0  ;;  %vm861_vm3 = vmand %vm838_vm12, %vm853_vm2  ;;  %vm845_vm6 = vcmp.ne.s32.totalorder %v807_v43, %v3213_v58  ;;  %vm946_vm9 = vcmp.eq.s32.totalorder %v912_v35, %v3331_v14  ;;  %v1060_v2 = vsel %vm947_vm5, %v3304_v8, 0.0 }
 0x208   :  { %v875_v31 = vsel %vm3369_vm7, %v2021_v20, 0.0  ;;  %v2023_v45 = vpop.eup %2022  ;;  %vm869_vm7 = vmand %vm846_vm15, %vm853_vm2  ;;  %v1059_v34 = vsel %vm946_vm9, %v878_v53, 0.0  ;;  %vm949_vm12 = vcmp.eq.s32.totalorder %v921_v22, %v3331_v14  ;;  %v918_v53 = vpop.permute.xlu1 %917  ;;  %vm942_vm15 = vcmp.eq.s32.totalorder %v3238_v23, %v3331_v14 }
 0x209   :  { %v2025_v62 = vpop.eup %2024  ;;  %v3413_v46 = vsel %vm867_vm11, %v2023_v45, 0.0  ;;  %vm860_vm8 = vmand %vm837_vm4, %vm853_vm2  ;;  %vm941_vm11 = vcmp.eq.s32.totalorder %v3208_v38, %v3331_v14  ;;  %vm948_vm13 = vcmp.eq.s32.totalorder %v918_v53, %v3331_v14  ;;  %v1062_v4 = vsel %vm949_vm12, %v3362_v32, 0.0 }
 0x20a   :  { %1069 = vadd.xlane.f32.xlu1 %v1052_v44  ;;  %v2027_v28 = vpop.eup %2026  ;;  %v874_v39 = vsel %vm3400_vm14, %v2025_v62, 0.0  ;;  %vm868_vm10 = vmand %vm845_vm6, %vm853_vm2  ;;  %vm940_vm2 = vcmp.eq.s32.totalorder %v3200_v16, %v3331_v14  ;;  %v1054_v8 = vsel %vm941_vm11, %v3347_v15, 0.0  ;;  %v1061_v3 = vsel %vm948_vm13, %v880_v61, 0.0  ;;  %v927_v16 = vpop.permute.xlu0 %926 }
 0x20b   :  { %1067 = vadd.xlane.f32.xlu0 %v1051_v21  ;;  %v882_v42 = vsel %vm866_vm1, %v2027_v28, 0.0  ;;  %v1053_v56 = vsel %vm940_vm2, %v872_v17, 0.0  ;;  %vm943_vm14 = vcmp.eq.s32.totalorder %v3255_v55, %v3331_v14  ;;  %vm951_vm1 = vcmp.eq.s32.totalorder %v927_v16, %v3331_v14 }
 0x20c   :  { %v2029_v59 = vpop.eup %2028  ;;  %v924_v38 = vpop.permute.xlu1 %923  ;;  %v1056_v18 = vsel %vm943_vm14, %v875_v31, 0.0  ;;  %v1064_v23 = vsel %vm951_vm1, %v3413_v46, 0.0  ;;  %vm945_vm5 = vcmp.eq.s32.totalorder %v3376_v12, %v3331_v14 }
 0x20d   :  { %v2031_v27 = vpop.eup %2030  ;;  %v877_v9 = vsel %vm861_vm3, %v2029_v59, 0.0  ;;  %vm950_vm4 = vcmp.eq.s32.totalorder %v924_v38, %v3331_v14  ;;  %vm944_vm3 = vcmp.eq.s32.totalorder %v3289_v37, %v3331_v14 }
 0x20e   :  { %v2033_v54 = vpop.eup %2032  ;;  %1085 = vadd.xlane.f32.xlu1 %v1060_v2  ;;  %v885_v19 = vsel %vm869_vm7, %v2031_v27, 0.0  ;;  %v933_v36 = vpop.permute.xlu0 %932  ;;  %v1063_v55 = vsel %vm950_vm4, %v882_v42, 0.0  ;;  %v1058_v48 = vsel %vm945_vm5, %v877_v9, 0.0 }
 0x20f   :  { %v2035_v0 = vpop.eup %2034  ;;  %1083 = vadd.xlane.f32.xlu0 %v1059_v34  ;;  %v876_v29 = vsel %vm860_vm8, %v2033_v54, 0.0  ;;  %vm953_vm6 = vcmp.eq.s32.totalorder %v933_v36, %v3331_v14 }
 0x210   :  { %v884_v58 = vsel %vm868_vm10, %v2035_v0, 0.0  ;;  %v930_v6 = vpop.permute.xlu1 %929  ;;  %v1066_v20 = vsel %vm953_vm6, %v885_v19, 0.0 }
 0x211   :  { %vm952_vm7 = vcmp.eq.s32.totalorder %v930_v6, %v3331_v14 }
 0x212   :  { %976 = vadd.xlane.f32.xlu1 %v3347_v15  ;;  %v1055_v15 = vsel %vm942_vm15, %v874_v39, 0.0  ;;  %v1065_v12 = vsel %vm952_vm7, %v884_v58, 0.0 }
 0x213   :  { %974 = vadd.xlane.f32.xlu0 %v872_v17  ;;  %v1057_v17 = vsel %vm944_vm3, %v876_v29, 0.0 }
 0x214   :  { %v3451_v51 = vpop.xlane.xlu1 %1166 }
 0x215   :  { %vm1200_vm10 = vcmp.eq.f32.partialorder %v3451_v51, inf  ;;  %v1203_v22 = vand.u32 2147483648, %v3451_v51  ;;  %vm1202_vm12 = vcmp.eq.f32.partialorder %v3451_v51, 0.0 }
 0x216   :  { %992 = vadd.xlane.f32.xlu1 %v3362_v32  ;;  %v3454_v32 = vpop.xlane.xlu0 %1168 }
 0x217   :  { %990 = vadd.xlane.f32.xlu0 %v880_v61  ;;  %2036 = vrsqrt.f32 %v3454_v32  ;;  %vm1207_vm8 = vcmp.eq.f32.partialorder %v3454_v32, inf  ;;  %vm1209_vm9 = vcmp.eq.f32.partialorder %v3454_v32, 0.0  ;;  %v1210_v34 = vand.u32 2147483648, %v3454_v32 }
 0x218   :  { %v3458_v41 = vpop.xlane.xlu1 %1172  ;;  %2038 = vrsqrt.f32 %v3451_v51 }
 0x219   :  { %vm1221_vm5 = vcmp.eq.f32.partialorder %v3458_v41, inf  ;;  %vm1223_vm7 = vcmp.eq.f32.partialorder %v3458_v41, 0.0 }
 0x21a   :  { %1073 = vadd.xlane.f32.xlu1 %v1054_v8  ;;  %v3462_v33 = vpop.xlane.xlu0 %1170 }
 0x21b   :  { %1071 = vadd.xlane.f32.xlu0 %v1053_v56  ;;  %2040 = vrsqrt.f32 %v3462_v33  ;;  %vm1214_vm11 = vcmp.eq.f32.partialorder %v3462_v33, inf  ;;  %vm1216_vm2 = vcmp.eq.f32.partialorder %v3462_v33, 0.0 }
 0x21c   :  { %v3468_v43 = vpop.xlane.xlu1 %1176 }
 0x21e   :  { %1089 = vadd.xlane.f32.xlu1 %v1062_v4  ;;  %v3470_v61 = vpop.xlane.xlu0 %1174 }
 0x21f   :  { %1087 = vadd.xlane.f32.xlu0 %v1061_v3  ;;  %vm1228_vm4 = vcmp.eq.f32.partialorder %v3470_v61, inf  ;;  %vm1230_vm3 = vcmp.eq.f32.partialorder %v3470_v61, 0.0 }
 0x221   :  { %v2037_v28 = vpop.eup %2036 }
 0x222   :  { %980 = vadd.xlane.f32.xlu1 %v875_v31  ;;  %v3472_v31 = vpop.xlane.xlu1 %1180  ;;  %v3474_v52 = vpop.xlane.xlu0 %1178  ;;  %v1206_v27 = vmul.f32 %v2037_v28, %v3454_v32 }
 0x223   :  { %978 = vadd.xlane.f32.xlu0 %v874_v39  ;;  %v2039_v59 = vpop.eup %2038 }
 0x224   :  { %v1208_v0 = vsel %vm1207_vm8, %v3454_v32, %v1206_v27 }
 0x225   :  { %v1211_v3 = vsel %vm1209_vm9, %v1210_v34, %v1208_v0  ;;  %vm1242_vm9 = vcmp.eq.f32.partialorder %v3474_v52, inf }
 0x226   :  { %996 = vadd.xlane.f32.xlu1 %v3413_v46  ;;  %v1185_v37 = vpop.xlane.xlu1 %1184  ;;  %v1183_v45 = vpop.xlane.xlu0 %1182 }
 0x227   :  { %994 = vadd.xlane.f32.xlu0 %v882_v42  ;;  %2042 = vrsqrt.f32 %v1185_v37  ;;  %v2041_v42 = vpop.eup %2040  ;;  %vm1263_vm13 = vcmp.eq.f32.partialorder %v1185_v37, inf  ;;  %vm1256_vm14 = vcmp.eq.f32.partialorder %v1183_v45, inf  ;;  %v1266_v16 = vand.u32 2147483648, %v1185_v37 }
 0x228   :  { %2044 = vrsqrt.f32 %v1183_v45  ;;  %vm1265_vm15 = vcmp.eq.f32.partialorder %v1185_v37, 0.0  ;;  %vm1258_vm1 = vcmp.eq.f32.partialorder %v1183_v45, 0.0 }
 0x229   :  { %2046 = vrsqrt.f32 %v3470_v61 }
 0x22a   :  { %1077 = vadd.xlane.f32.xlu1 %v1056_v18  ;;  %v3476_v30 = vpop.xlane.xlu1 %1188  ;;  %v3478_v44 = vpop.xlane.xlu0 %1186  ;;  %2048 = vrsqrt.f32 %v3458_v41  ;;  %v1259_v18 = vand.u32 2147483648, %v1183_v45 }
 0x22b   :  { %1075 = vadd.xlane.f32.xlu0 %v1055_v15  ;;  %2050 = vrsqrt.f32 %v3474_v52  ;;  %vm1270_vm6 = vcmp.eq.f32.partialorder %v3478_v44, inf  ;;  %vm1277_vm8 = vcmp.eq.f32.partialorder %v3476_v30, inf }
 0x22c   :  { %2052 = vrsqrt.f32 %v3478_v44 }
 0x22d   :  { %2054 = vrsqrt.f32 %v3476_v30 }
 0x22e   :  { %984 = vadd.xlane.f32.xlu1 %v877_v9  ;;  %v3480_v62 = vpop.xlane.xlu1 %1192  ;;  %v3483_v14 = vpop.xlane.xlu0 %1190  ;;  %v1199_v9 = vmul.f32 %v2039_v59, %v3451_v51 }
 0x22f   :  { %982 = vadd.xlane.f32.xlu0 %v876_v29 }
 0x230   :  { %v1201_v4 = vsel %vm1200_vm10, %v3451_v51, %v1199_v9  ;;  %vm1272_vm10 = vcmp.eq.f32.partialorder %v3478_v44, 0.0 }
 0x231   :  { %v2043_v2 = vpop.eup %2042  ;;  %v1204_v15 = vsel %vm1202_vm12, %v1203_v22, %v1201_v4  ;;  %v1224_v22 = vand.u32 2147483648, %v3458_v41  ;;  %vm1235_vm12 = vcmp.eq.f32.partialorder %v3468_v43, inf }
 0x232   :  { %1000 = vadd.xlane.f32.xlu1 %v885_v19  ;;  %v3487_v21 = vpop.xlane.xlu1 %1196  ;;  %v3489_v46 = vpop.xlane.xlu0 %1194  ;;  %v1213_v19 = vmul.f32 %v2041_v42, %v3462_v33  ;;  %v1262_v56 = vmul.f32 %v2043_v2, %v1185_v37 }
 0x233   :  { %998 = vadd.xlane.f32.xlu0 %v884_v58  ;;  %v2045_v54 = vpop.eup %2044  ;;  %v1217_v58 = vand.u32 2147483648, %v3462_v33 }
 0x234   :  { %v1255_v53 = vmul.f32 %v2045_v54, %v1183_v45  ;;  %v1215_v38 = vsel %vm1214_vm11, %v3462_v33, %v1213_v19  ;;  %v1264_v6 = vsel %vm1263_vm13, %v1185_v37, %v1262_v56  ;;  %v1231_v19 = vand.u32 2147483648, %v3470_v61 }
 0x235   :  { %v1218_v36 = vsel %vm1216_vm2, %v1217_v58, %v1215_v38  ;;  %vm1244_vm11 = vcmp.eq.f32.partialorder %v3474_v52, 0.0  ;;  %vm1279_vm2 = vcmp.eq.f32.partialorder %v3476_v30, 0.0  ;;  %vm1284_vm13 = vcmp.eq.f32.partialorder %v3483_v14, inf }
 0x236   :  { %1093 = vadd.xlane.f32.xlu1 %v1064_v23  ;;  %v3491_v39 = vpop.xlane.xlu1 %1376  ;;  %v3493_v35 = vpop.xlane.xlu0 %1374  ;;  %v1257_v51 = vsel %vm1256_vm14, %v1183_v45, %v1255_v53  ;;  %v1311_v23 = vmax.f32 %v1211_v3, 0.0001  ;;  %v1312_v28 = vmax.f32 %v1218_v36, 0.0001  ;;  %vm1237_vm14 = vcmp.eq.f32.partialorder %v3468_v43, 0.0 }
 0x237   :  { %1091 = vadd.xlane.f32.xlu0 %v1063_v55  ;;  %v1407_v36 = vmul.f32 %v3030_v25, %v3491_v39  ;;  %v1406_v39 = vmul.f32 %v3068_v49, %v3493_v35 }
 0x238   :  { %2056 = vrcp.f32 %v1311_v23 }
 0x239   :  { %2058 = vrsqrt.f32 %v3468_v43 }
 0x23a   :  { %1081 = vadd.xlane.f32.xlu1 %v1058_v48  ;;  %v3507_v29 = vpop.xlane.xlu1 %1380  ;;  %v3512_v8 = vpop.xlane.xlu0 %1378  ;;  %v1310_v48 = vmax.f32 %v1204_v15, 0.0001 }
 0x23b   :  { %1079 = vadd.xlane.f32.xlu0 %v1057_v17  ;;  %v1267_v17 = vsel %vm1265_vm15, %v1266_v16, %v1264_v6  ;;  %v1280_v6 = vand.u32 2147483648, %v3476_v30  ;;  %vm1286_vm15 = vcmp.eq.f32.partialorder %v3483_v14, 0.0 }
 0x23c   :  { %v1319_v37 = vmax.f32 %v1267_v17, 0.0001  ;;  %2060 = vrcp.f32 %v1310_v48 }
 0x23d   :  { %2062 = vrcp.f32 %v1312_v28 }
 0x23e   :  { %1097 = vadd.xlane.f32.xlu1 %v1066_v20  ;;  %v3523_v32 = vpop.xlane.xlu1 %1384  ;;  %v3525_v55 = vpop.xlane.xlu0 %1382  ;;  %2064 = vrsqrt.f32 %v3483_v14 }
 0x23f   :  { %1095 = vadd.xlane.f32.xlu0 %v1065_v12  ;;  %v2047_v20 = vpop.eup %2046  ;;  %v1260_v12 = vsel %vm1258_vm1, %v1259_v18, %v1257_v51  ;;  %2066 = vrcp.f32 %v1319_v37  ;;  %vm1298_vm1 = vcmp.eq.f32.partialorder %v3489_v46, inf }
 0x240   :  { %v2049_v59 = vpop.eup %2048  ;;  %v1227_v33 = vmul.f32 %v2047_v20, %v3470_v61  ;;  %v1318_v45 = vmax.f32 %v1260_v12, 0.0001  ;;  %v1245_v20 = vand.u32 2147483648, %v3474_v52 }
 0x241   :  { %v2051_v42 = vpop.eup %2050  ;;  %v1220_v9 = vmul.f32 %v2049_v59, %v3458_v41 }
 0x242   :  { %v3529_v27 = vpop.xlane.xlu1 %1388  ;;  %v2053_v2 = vpop.eup %2052  ;;  %v1229_v0 = vsel %vm1228_vm4, %v3470_v61, %v1227_v33  ;;  %2068 = vrcp.f32 %v1318_v45  ;;  %v1241_v4 = vmul.f32 %v2051_v42, %v3474_v52  ;;  %v1273_v61 = vand.u32 2147483648, %v3478_v44 }
 0x243   :  { %v3533_v54 = vpop.xlane.xlu0 %1386  ;;  %v2055_v34 = vpop.eup %2054  ;;  %v1269_v58 = vmul.f32 %v2053_v2, %v3478_v44  ;;  %v1222_v56 = vsel %vm1221_vm5, %v3458_v41, %v1220_v9  ;;  %2070 = vrsqrt.f32 %v3489_v46  ;;  %v1232_v38 = vsel %vm1230_vm3, %v1231_v19, %v1229_v0 }
 0x244   :  { %v1276_v53 = vmul.f32 %v2055_v34, %v3476_v30  ;;  %v2057_v18 = vpop.eup %2056  ;;  %v1225_v15 = vsel %vm1223_vm7, %v1224_v22, %v1222_v56  ;;  %2072 = vrsqrt.f32 %v3472_v31  ;;  %v1243_v17 = vsel %vm1242_vm9, %v3474_v52, %v1241_v4 }
 0x245   :  { %v1271_v41 = vsel %vm1270_vm6, %v3478_v44, %v1269_v58  ;;  %v2059_v51 = vpop.eup %2058  ;;  %v1314_v12 = vmax.f32 %v1232_v38, 0.0001  ;;  %2074 = vrsqrt.f32 %v3480_v62  ;;  %v1313_v59 = vmax.f32 %v1225_v15, 0.0001 }
 0x246   :  { %v1393_v3 = vpop.xlane.xlu1 %1392  ;;  %v1278_v23 = vsel %vm1277_vm8, %v3476_v30, %v1276_v53  ;;  %v2061_v48 = vpop.eup %2060  ;;  %v1274_v25 = vsel %vm1272_vm10, %v1273_v61, %v1271_v41  ;;  %v1234_v30 = vmul.f32 %v2059_v51, %v3468_v43  ;;  %v1423_v33 = vmul.f32 %v2057_v18, %v1407_v36 }
 0x247   :  { %v1391_v16 = vpop.xlane.xlu0 %1390  ;;  %v2063_v28 = vpop.eup %2062  ;;  %v1281_v37 = vsel %vm1279_vm2, %v1280_v6, %v1278_v23  ;;  %v1415_v45 = vmul.f32 %v3082_v7, %v1393_v3  ;;  %v1422_v34 = vmul.f32 %v2061_v48, %v1406_v39  ;;  %v1408_v44 = vmul.f32 %v3052_v26, %v3512_v8 }
 0x248   :  { %v2065_v42 = vpop.eup %2064  ;;  %v1414_v19 = vmul.f32 %v3076_v50, %v1391_v16  ;;  %2076 = vrsqrt.f32 %v3487_v21  ;;  %v1246_v0 = vsel %vm1244_vm11, %v1245_v20, %v1243_v17  ;;  %v1320_v7 = vmax.f32 %v1274_v25, 0.0001 }
 0x249   :  { %v2067_v9 = vpop.eup %2066  ;;  %2078 = vrcp.f32 %v1314_v12  ;;  %v1238_v22 = vand.u32 2147483648, %v3468_v43  ;;  %v1321_v26 = vmax.f32 %v1281_v37, 0.0001  ;;  %v1283_v50 = vmul.f32 %v2065_v42, %v3483_v14 }
 0x24a   :  { %v3572_v2 = vpop.xlane.xlu1 %1396  ;;  %2080 = vrcp.f32 %v1313_v59  ;;  %v1236_v8 = vsel %vm1235_vm12, %v3468_v43, %v1234_v30  ;;  %v1717_v56 = vadd.f32 -1.0, %v1423_v33  ;;  %v1431_v52 = vmul.f32 %v2067_v9, %v1415_v45 }
 0x24b   :  { %v3578_v49 = vpop.xlane.xlu0 %1394  ;;  %v1716_v53 = vadd.f32 -1.0, %v1422_v34  ;;  %v1424_v4 = vmul.f32 %v2063_v28, %v1408_v44  ;;  %v1316_v3 = vmax.f32 %v1246_v0, 0.0001  ;;  %v1287_v61 = vand.u32 2147483648, %v3483_v14 }
 0x24c   :  { %v2069_v35 = vpop.eup %2068  ;;  %2082 = vrcp.f32 %v1320_v7  ;;  %vm1300_vm4 = vcmp.eq.f32.partialorder %v3489_v46, 0.0  ;;  %v1239_v15 = vsel %vm1237_vm14, %v1238_v22, %v1236_v8  ;;  %v1285_v51 = vsel %vm1284_vm13, %v3483_v14, %v1283_v50  ;;  %v954_v8 = vld [vmem:[#allocation3] sm:$0xff] }
 0x24d   :  { %v2071_v58 = vpop.eup %2070  ;;  %v1430_v38 = vmul.f32 %v2069_v35, %v1414_v19  ;;  %2084 = vrcp.f32 %v1321_v26  ;;  %v1301_v23 = vand.u32 2147483648, %v3489_v46  ;;  %v1455_v48 = vmul.f32 2.0, %v1717_v56 }
 0x24e   :  { %v1297_v16 = vmul.f32 %v2071_v58, %v3489_v46  ;;  %v3592_v18 = vpop.xlane.xlu1 %1400  ;;  %v2073_v41 = vpop.eup %2072  ;;  %v1725_v17 = vadd.f32 -1.0, %v1431_v52  ;;  %v1454_v20 = vmul.f32 2.0, %v1716_v53  ;;  %v1718_v12 = vadd.f32 -1.0, %v1424_v4 }
 0x24f   :  { %v3598_v6 = vpop.xlane.xlu0 %1398  ;;  %v2075_v36 = vpop.eup %2074  ;;  %2086 = vrcp.f32 %v1316_v3  ;;  %v1724_v28 = vadd.f32 -1.0, %v1430_v38  ;;  %vm1249_vm5 = vcmp.eq.f32.partialorder %v3472_v31, inf  ;;  %vm1251_vm3 = vcmp.eq.f32.partialorder %v3472_v31, 0.0 }
 0x250   :  { %v1299_v25 = vsel %vm1298_vm1, %v3489_v46, %v1297_v16  ;;  %v1315_v43 = vmax.f32 %v1239_v15, 0.0001  ;;  %v3609_v59 = vsel %vm1286_vm15, %v1287_v61, %v1285_v51  ;;  %v1248_v42 = vmul.f32 %v2073_v41, %v3472_v31  ;;  %v963_v51 = vld [vmem:[#allocation3 + $0x48] sm:$0xff] }
 0x251   :  { %v1252_v30 = vand.u32 2147483648, %v3472_v31  ;;  %v1290_v37 = vmul.f32 %v2075_v36, %v3480_v62  ;;  %vm1291_vm6 = vcmp.eq.f32.partialorder %v3480_v62, inf  ;;  %v1472_v45 = vmul.f32 1.442695, %v1455_v48 }
 0x252   :  { %v2077_v39 = vpop.eup %2076  ;;  %v1409_v9 = vmul.f32 %v3084_v57, %v3507_v29  ;;  %v1463_v34 = vmul.f32 2.0, %v1725_v17  ;;  %v3617_v44 = vpop.xlane.xlu1 %1404  ;;  %v1302_v14 = vsel %vm1300_vm4, %v1301_v23, %v1299_v25  ;;  %v1470_v35 = vmul.f32 1.442695, %v1454_v20  ;;  %v955_v57 = vld [vmem:[#allocation3 + $0x8] sm:$0xff]  ;;  %v962_v17 = vld [vmem:[#allocation3 + $0x40] sm:$0xff] }
 0x253   :  { %v2079_v33 = vpop.eup %2078  ;;  %v1456_v0 = vmul.f32 2.0, %v1718_v12  ;;  %v1462_v7 = vmul.f32 2.0, %v1724_v28  ;;  %v3621_v58 = vpop.xlane.xlu0 %1402  ;;  %vm1293_vm7 = vcmp.eq.f32.partialorder %v3480_v62, 0.0  ;;  %v1294_v22 = vand.u32 2147483648, %v3480_v62 }
 0x254   :  { %v2081_v19 = vpop.eup %2080  ;;  %v1304_v26 = vmul.f32 %v2077_v39, %v3487_v21  ;;  %2088 = vrcp.f32 %v1315_v43  ;;  %v1250_v29 = vsel %vm1249_vm5, %v3472_v31, %v1248_v42  ;;  %v1292_v46 = vsel %vm1291_vm6, %v3480_v62, %v1290_v37  ;;  %v1036_v42 = vld [vmem:[#allocation2 + $0x8] sm:$0xff] }
 0x255   :  { %vm1305_vm8 = vcmp.eq.f32.partialorder %v3487_v21, inf  ;;  %v1416_v50 = vmul.f32 %v3039_v11, %v3578_v49  ;;  %2090 = vpow2.f32 %v1472_v45  ;;  %v1425_v52 = vmul.f32 %v2081_v19, %v1409_v9  ;;  %v1035_v9 = vld [vmem:[#allocation2] sm:$0xff] }
 0x256   :  { %v2083_v56 = vpop.eup %2082  ;;  %v1488_v53 = vmul.f32 1.442695, %v1463_v34  ;;  %v1417_v4 = vmul.f32 %v3070_v5, %v3572_v2  ;;  %2092 = vpow2.f32 %v1470_v35  ;;  %v1486_v61 = vmul.f32 1.442695, %v1462_v7 }
 0x257   :  { %v2085_v38 = vpop.eup %2084  ;;  %v1308_v16 = vand.u32 2147483648, %v3487_v21  ;;  %v1295_v36 = vsel %vm1293_vm7, %v1294_v22, %v1292_v46  ;;  %v1306_v11 = vsel %vm1305_vm8, %v3487_v21, %v1304_v26  ;;  %vm1307_vm9 = vcmp.eq.f32.partialorder %v3487_v21, 0.0 }
 0x258   :  { %v1253_v2 = vsel %vm1251_vm3, %v1252_v30, %v1250_v29  ;;  %v1410_v23 = vmul.f32 %v3086_v10, %v3525_v55  ;;  %v1322_v48 = vmax.f32 %v3609_v59, 0.0001  ;;  %v1324_v62 = vmax.f32 %v1302_v14, 0.0001 }
 0x259   :  { %v3644_v5 = vpop.eup %2086  ;;  %v1432_v20 = vmul.f32 %v2083_v56, %v1416_v50  ;;  %v1719_v12 = vadd.f32 -1.0, %v1425_v52  ;;  %2094 = vpow2.f32 %v1488_v53  ;;  %v1433_v28 = vmul.f32 %v2085_v38, %v1417_v4  ;;  %v1043_v52 = vld [vmem:[#allocation2 + $0x40] sm:$0xff] }
 0x25a   :  { %2096 = vpow2.f32 %v1486_v61  ;;  %v1309_v31 = vsel %vm1307_vm9, %v1308_v16, %v1306_v11  ;;  %v1323_v43 = vmax.f32 %v1295_v36, 0.0001  ;;  %v1474_v55 = vmul.f32 1.442695, %v1456_v0  ;;  %v957_v36 = vld [vmem:[#allocation3 + $0x18] sm:$0xff] }
 0x25b   :  { %v1426_v30 = vmul.f32 %v2079_v33, %v1410_v23  ;;  %2098 = vrcp.f32 %v1322_v48  ;;  %v1411_v37 = vmul.f32 %v3112_v1, %v3523_v32  ;;  %v1317_v45 = vmax.f32 %v1253_v2, 0.0001 }
 0x25c   :  { %v1457_v19 = vmul.f32 2.0, %v1719_v12  ;;  %2100 = vrcp.f32 %v1324_v62  ;;  %v1727_v21 = vadd.f32 -1.0, %v1433_v28  ;;  %v1325_v14 = vmax.f32 %v1309_v31, 0.0001  ;;  %v956_v62 = vld [vmem:[#allocation3 + $0x10] sm:$0xff] }
 0x25d   :  { %v1726_v0 = vadd.f32 -1.0, %v1432_v20  ;;  %2102 = vrcp.f32 %v1323_v43  ;;  %v1412_v1 = vmul.f32 %v3122_v60, %v3533_v54  ;;  %v1720_v46 = vadd.f32 -1.0, %v1426_v30 }
 0x25e   :  { %v2089_v34 = vpop.eup %2088  ;;  %2104 = vpow2.f32 %v1474_v55  ;;  %v1476_v53 = vmul.f32 1.442695, %v1457_v19  ;;  %v1465_v4 = vmul.f32 2.0, %v1727_v21  ;;  %v1418_v2 = vmul.f32 %v3096_v40, %v3598_v6  ;;  %v965_v55 = vld [vmem:[#allocation3 + $0x58] sm:$0xff] }
 0x25f   :  { %v3659_v22 = vpop.eup %2090  ;;  %v1427_v50 = vmul.f32 %v2089_v34, %v1411_v37  ;;  %2106 = vrcp.f32 %v1317_v45  ;;  %v1464_v54 = vmul.f32 2.0, %v1726_v0  ;;  %v964_v37 = vld [vmem:[#allocation3 + $0x50] sm:$0xff] }
 0x260   :  { %v3663_v29 = vpop.eup %2092  ;;  %2108 = vrcp.f32 %v1325_v14  ;;  %v1492_v20 = vmul.f32 1.442695, %v1465_v4 }
 0x261   :  { %v1490_v31 = vmul.f32 1.442695, %v1464_v54 }
 0x263   :  { %v3669_v16 = vpop.eup %2094 }
 0x264   :  { %v3671_v11 = vpop.eup %2096 }
 0x28f   :  { %v973_v3 = vpop.xlane.xlu1 %972 }
 0x290   :  { %v1003_v41 = vadd.f32 %v973_v3, %v955_v57  ;;  %v971_v15 = vpop.xlane.xlu0 %970  ;;  %v1044_v57 = vld [vmem:[#allocation2 + $0x48] sm:$0xff] }
 0x291   :  { %v1002_v49 = vadd.f32 %v971_v15, %v954_v8 }
 0x292   :  { %1020 = vst.msk [vmem:[#allocation3 + $0x8] sm:$0xff] %vm52_vm0, %v1003_v41 }
 0x293   :  { %1019 = vst.msk [vmem:[#allocation3] sm:$0xff] %vm52_vm0, %v1002_v49  ;;  %v989_v25 = vpop.xlane.xlu1 %988  ;;  %v1458_v49 = vmul.f32 2.0, %v1720_v46 }
 0x294   :  { %v1011_v39 = vadd.f32 %v989_v25, %v963_v51  ;;  %v987_v10 = vpop.xlane.xlu0 %986  ;;  %v1428_v51 = vmul.f32 %v3644_v5, %v1412_v1  ;;  %v2099_v25 = vpop.eup %2098  ;;  %v1420_v5 = vmul.f32 %v3128_v24, %v3621_v58  ;;  %v1413_v58 = vmul.f32 %v3134_v47, %v3529_v27 }
 0x295   :  { %v1010_v59 = vadd.f32 %v987_v10, %v962_v17  ;;  %v1721_v17 = vadd.f32 -1.0, %v1427_v50  ;;  %v2101_v43 = vpop.eup %2100  ;;  %v1434_v19 = vmul.f32 %v2099_v25, %v1418_v2  ;;  %v1421_v47 = vmul.f32 %v3144_v13, %v3617_v44  ;;  %v1037_v50 = vld [vmem:[#allocation2 + $0x10] sm:$0xff] }
 0x296   :  { %1028 = vst.msk [vmem:[#allocation3 + $0x48] sm:$0xff] %vm52_vm0, %v1011_v39  ;;  %v1419_v39 = vmul.f32 %v3106_v63, %v3592_v18  ;;  %v1436_v21 = vmul.f32 %v2101_v43, %v1420_v5 }
 0x297   :  { %1027 = vst.msk [vmem:[#allocation3 + $0x40] sm:$0xff] %vm52_vm0, %v1010_v59  ;;  %v1070_v35 = vpop.xlane.xlu1 %1069  ;;  %v2103_v59 = vpop.eup %2102  ;;  %v1459_v24 = vmul.f32 2.0, %v1721_v17 }
 0x298   :  { %v1100_v7 = vadd.f32 %v1070_v35, %v1036_v42  ;;  %v1068_v33 = vpop.xlane.xlu0 %1067  ;;  %v1722_v42 = vadd.f32 -1.0, %v1428_v51  ;;  %v3685_v45 = vpop.eup %2104 }
 0x299   :  { %v1535_v32 = vld [vmem:[#allocation3 + $0x8] sm:$0xff]  ;;  %v1099_v26 = vadd.f32 %v1068_v33, %v1035_v9  ;;  %v1478_v9 = vmul.f32 1.442695, %v1458_v49  ;;  %v2107_v18 = vpop.eup %2106 }
 0x29a   :  { %v1551_v8 = vadd.f32 %v3659_v22, %v1535_v32  ;;  %v1534_v56 = vld [vmem:[#allocation3] sm:$0xff]  ;;  %1116 = vst.msk [vmem:[#allocation2 + $0x8] sm:$0xff] %vm52_vm0, %v1100_v7  ;;  %v2109_v0 = vpop.eup %2108  ;;  %v1435_v7 = vmul.f32 %v2103_v59, %v1419_v39  ;;  %v1038_v32 = vld [vmem:[#allocation2 + $0x18] sm:$0xff] }
 0x29b   :  { %v1550_v3 = vadd.f32 %v3663_v29, %v1534_v56  ;;  %1115 = vst.msk [vmem:[#allocation2] sm:$0xff] %vm52_vm0, %v1099_v26  ;;  %v1086_v60 = vpop.xlane.xlu1 %1085  ;;  %v1480_v56 = vmul.f32 1.442695, %v1459_v24  ;;  %v1437_v51 = vmul.f32 %v2109_v0, %v1421_v47  ;;  %v2214_v47 = vld [vmem:[%s3887_s3 + $0x8] sm:$0xff] }
 0x29c   :  { %2110 = vrcp.f32 %v1551_v8  ;;  %v1108_v38 = vadd.f32 %v1086_v60, %v1044_v57  ;;  %v1084_v61 = vpop.xlane.xlu0 %1083  ;;  %v1460_v57 = vmul.f32 2.0, %v1722_v42  ;;  %v1730_v60 = vadd.f32 -1.0, %v1436_v21 }
 0x29d   :  { %2112 = vrcp.f32 %v1550_v3  ;;  %v1543_v41 = vld [vmem:[#allocation3 + $0x48] sm:$0xff]  ;;  %v1107_v15 = vadd.f32 %v1084_v61, %v1043_v52  ;;  %v1429_v52 = vmul.f32 %v2107_v18, %v1413_v58  ;;  %v1728_v3 = vadd.f32 -1.0, %v1434_v19 }
 0x29e   :  { %v1559_v23 = vadd.f32 %v3669_v16, %v1543_v41  ;;  %v1542_v48 = vld [vmem:[#allocation3 + $0x40] sm:$0xff]  ;;  %1124 = vst.msk [vmem:[#allocation2 + $0x48] sm:$0xff] %vm52_vm0, %v1108_v38  ;;  %2114 = vpow2.f32 %v1476_v53  ;;  %v1731_v42 = vadd.f32 -1.0, %v1437_v51  ;;  %v1482_v24 = vmul.f32 1.442695, %v1460_v57 }
 0x29f   :  { %v1558_v12 = vadd.f32 %v3671_v11, %v1542_v48  ;;  %1123 = vst.msk [vmem:[#allocation2 + $0x40] sm:$0xff] %vm52_vm0, %v1107_v15  ;;  %v977_v28 = vpop.xlane.xlu1 %976  ;;  %v1466_v25 = vmul.f32 2.0, %v1728_v3  ;;  %vm1647_vm10 = vcmp.ge.s32.totalorder %v2214_v47, 0 }
 0x2a0   :  { %2116 = vrcp.f32 %v1559_v23  ;;  %v1005_v40 = vadd.f32 %v977_v28, %v957_v36  ;;  %v975_v6 = vpop.xlane.xlu0 %974  ;;  %v1046_v36 = vld [vmem:[#allocation2 + $0x58] sm:$0xff] }
 0x2a1   :  { %2118 = vrcp.f32 %v1558_v12  ;;  %v1004_v10 = vadd.f32 %v975_v6, %v956_v62  ;;  %v1503_v30 = vld [vmem:[#allocation2 + $0x8] sm:$0xff]  ;;  %v1045_v62 = vld [vmem:[#allocation2 + $0x50] sm:$0xff]  ;;  %v1468_v6 = vmul.f32 2.0, %v1730_v60  ;;  %v1494_v18 = vmul.f32 1.442695, %v1466_v25 }
 0x2a2   :  { %1022 = vst.msk [vmem:[#allocation3 + $0x18] sm:$0xff] %vm52_vm0, %v1005_v40  ;;  %2120 = vpow2.f32 %v1492_v20  ;;  %v1502_v34 = vld [vmem:[#allocation2] sm:$0xff]  ;;  %v1519_v33 = vadd.f32 %v3659_v22, %v1503_v30  ;;  %v1723_v20 = vadd.f32 -1.0, %v1429_v52 }
 0x2a3   :  { %1021 = vst.msk [vmem:[#allocation3 + $0x10] sm:$0xff] %vm52_vm0, %v1004_v10  ;;  %v993_v63 = vpop.xlane.xlu1 %992  ;;  %2122 = vpow2.f32 %v1490_v31  ;;  %v1518_v27 = vadd.f32 %v3663_v29, %v1502_v34  ;;  %v1729_v29 = vadd.f32 -1.0, %v1435_v7  ;;  %v959_v10 = vld [vmem:[#allocation3 + $0x28] sm:$0xff] }
 0x2a4   :  { %v1013_v14 = vadd.f32 %v993_v63, %v965_v55  ;;  %v991_v35 = vpop.xlane.xlu0 %990  ;;  %2124 = vpow2.f32 %v1478_v9  ;;  %v958_v9 = vld [vmem:[#allocation3 + $0x20] sm:$0xff]  ;;  %v1461_v58 = vmul.f32 2.0, %v1723_v20  ;;  %v967_v7 = vld [vmem:[#allocation3 + $0x68] sm:$0xff] }
 0x2a5   :  { %v1012_v1 = vadd.f32 %v991_v35, %v964_v37  ;;  %v1511_v46 = vld [vmem:[#allocation2 + $0x48] sm:$0xff]  ;;  %v1467_v59 = vmul.f32 2.0, %v1729_v29  ;;  %v1498_v35 = vmul.f32 1.442695, %v1468_v6 }
 0x2a6   :  { %v2111_v26 = vpop.eup %2110  ;;  %1030 = vst.msk [vmem:[#allocation3 + $0x58] sm:$0xff] %vm52_vm0, %v1013_v14  ;;  %v1510_v4 = vld [vmem:[#allocation2 + $0x40] sm:$0xff]  ;;  %v1527_v61 = vadd.f32 %v3669_v16, %v1511_v46  ;;  %v1484_v46 = vmul.f32 1.442695, %v1461_v58  ;;  %v1040_v29 = vld [vmem:[#allocation2 + $0x28] sm:$0xff] }
 0x2a7   :  { %v2113_v8 = vpop.eup %2112  ;;  %v1569_v53 = vmul.f32 %v2111_v26, %v1519_v33  ;;  %1029 = vst.msk [vmem:[#allocation3 + $0x50] sm:$0xff] %vm52_vm0, %v1012_v1  ;;  %v1074_v22 = vpop.xlane.xlu1 %1073  ;;  %v1526_v2 = vadd.f32 %v3671_v11, %v1510_v4  ;;  %v1496_v33 = vmul.f32 1.442695, %v1467_v59  ;;  %v1469_v1 = vmul.f32 2.0, %v1731_v42  ;;  %v966_v26 = vld [vmem:[#allocation3 + $0x60] sm:$0xff] }
 0x2a8   :  { %v1567_v54 = vmul.f32 %v2113_v8, %v1518_v27  ;;  %v1102_v38 = vadd.f32 %v1074_v22, %v1038_v32  ;;  %v1072_v13 = vpop.xlane.xlu0 %1071  ;;  %v3696_v44 = vpop.eup %2114  ;;  %v2215_v27 = vld [vmem:[%s3887_s3] sm:$0xff] }
 0x2a9   :  { %2126 = vlog2.f32 %v1569_v53  ;;  %v1537_v41 = vld [vmem:[#allocation3 + $0x18] sm:$0xff]  ;;  %v1101_v15 = vadd.f32 %v1072_v13, %v1037_v50  ;;  %vm1646_vm11 = vcmp.ge.s32.totalorder %v2215_v27, 0 }
 0x2aa   :  { %v2117_v49 = vpop.eup %2116  ;;  %2128 = vlog2.f32 %v1567_v54  ;;  %v1553_v23 = vadd.f32 %v3696_v44, %v1537_v41  ;;  %v1536_v48 = vld [vmem:[#allocation3 + $0x10] sm:$0xff]  ;;  %1118 = vst.msk [vmem:[#allocation2 + $0x18] sm:$0xff] %vm52_vm0, %v1102_v38  ;;  %v2217_v41 = vld [vmem:[%s3887_s3 + $0x40] sm:$0xff] }
 0x2ab   :  { %v2119_v17 = vpop.eup %2118  ;;  %2130 = vpow2.f32 %v1480_v56  ;;  %v1585_v12 = vmul.f32 %v2117_v49, %v1527_v61  ;;  %v1552_v16 = vadd.f32 %v3685_v45, %v1536_v48  ;;  %1117 = vst.msk [vmem:[#allocation2 + $0x10] sm:$0xff] %vm52_vm0, %v1101_v15  ;;  %v1090_v28 = vpop.xlane.xlu1 %1089  ;;  %v2216_v56 = vld [vmem:[%s3887_s3 + $0x48] sm:$0xff]  ;;  %vm1654_vm12 = vcmp.ge.s32.totalorder %v2217_v41, 0  ;;  %v1039_v49 = vld [vmem:[#allocation2 + $0x20] sm:$0xff] }
 0x2ac   :  { %v1583_v31 = vmul.f32 %v2119_v17, %v1526_v2  ;;  %2132 = vrcp.f32 %v1553_v23  ;;  %v1110_v5 = vadd.f32 %v1090_v28, %v1046_v36  ;;  %v1088_v11 = vpop.xlane.xlu0 %1087  ;;  %v3704_v40 = vpop.eup %2120  ;;  %vm1655_vm2 = vcmp.ge.s32.totalorder %v2216_v56, 0 }
 0x2ad   :  { %2134 = vlog2.f32 %v1585_v12  ;;  %v1545_v43 = vld [vmem:[#allocation3 + $0x58] sm:$0xff]  ;;  %v1109_v39 = vadd.f32 %v1088_v11, %v1045_v62  ;;  %v3706_v55 = vpop.eup %2122  ;;  %v1500_v15 = vmul.f32 1.442695, %v1469_v1 }
 0x2ae   :  { %2136 = vlog2.f32 %v1583_v31  ;;  %v1561_v30 = vadd.f32 %v3704_v40, %v1545_v43  ;;  %v1544_v37 = vld [vmem:[#allocation3 + $0x50] sm:$0xff]  ;;  %1126 = vst.msk [vmem:[#allocation2 + $0x58] sm:$0xff] %vm52_vm0, %v1110_v5  ;;  %v3712_v14 = vpop.eup %2124  ;;  %v961_v43 = vld [vmem:[#allocation3 + $0x38] sm:$0xff] }
 0x2af   :  { %2138 = vrcp.f32 %v1552_v16  ;;  %v1560_v34 = vadd.f32 %v3706_v55, %v1544_v37  ;;  %1125 = vst.msk [vmem:[#allocation2 + $0x50] sm:$0xff] %vm52_vm0, %v1109_v39  ;;  %v981_v63 = vpop.xlane.xlu1 %980 }
 0x2b0   :  { %2140 = vrcp.f32 %v1561_v30  ;;  %v1007_v19 = vadd.f32 %v981_v63, %v959_v10  ;;  %v979_v21 = vpop.xlane.xlu0 %978  ;;  %v960_v30 = vld [vmem:[#allocation3 + $0x30] sm:$0xff] }
 0x2b1   :  { %2142 = vrcp.f32 %v1560_v34  ;;  %v1006_v0 = vadd.f32 %v979_v21, %v958_v9  ;;  %v1505_v32 = vld [vmem:[#allocation2 + $0x18] sm:$0xff] }
 0x2b2   :  { %1024 = vst.msk [vmem:[#allocation3 + $0x28] sm:$0xff] %vm52_vm0, %v1007_v19  ;;  %2144 = vpow2.f32 %v1482_v24  ;;  %v1504_v53 = vld [vmem:[#allocation2 + $0x10] sm:$0xff]  ;;  %v1521_v54 = vadd.f32 %v3696_v44, %v1505_v32 }
 0x2b3   :  { %v2127_v57 = vpop.eup %2126  ;;  %1023 = vst.msk [vmem:[#allocation3 + $0x20] sm:$0xff] %vm52_vm0, %v1006_v0  ;;  %v997_v50 = vpop.xlane.xlu1 %996  ;;  %2146 = vpow2.f32 %v1494_v18  ;;  %v1520_v44 = vadd.f32 %v3685_v45, %v1504_v53 }
 0x2b4   :  { %v2129_v8 = vpop.eup %2128  ;;  %v1601_v52 = vmul.f32 0.6931472, %v2127_v57  ;;  %v1015_v4 = vadd.f32 %v997_v50, %v967_v7  ;;  %v995_v22 = vpop.xlane.xlu0 %994  ;;  %2148 = vpow2.f32 %v1498_v35 }
 0x2b5   :  { %v3725_v3 = vpop.eup %2130  ;;  %v1599_v60 = vmul.f32 0.6931472, %v2129_v8  ;;  %v1513_v38 = vld [vmem:[#allocation2 + $0x58] sm:$0xff]  ;;  %v1014_v13 = vadd.f32 %v995_v22, %v966_v26  ;;  %2150 = vpow2.f32 %v1496_v33  ;;  %v968_v26 = vld [vmem:[#allocation3 + $0x70] sm:$0xff] }
 0x2b6   :  { %v2133_v61 = vpop.eup %2132  ;;  %v1631_v36 = vsub.f32 0.0, %v1601_v52  ;;  %1032 = vst.msk [vmem:[#allocation3 + $0x68] sm:$0xff] %vm52_vm0, %v1015_v4  ;;  %2152 = vpow2.f32 %v1484_v46  ;;  %v1512_v48 = vld [vmem:[#allocation2 + $0x50] sm:$0xff]  ;;  %v1529_v16 = vadd.f32 %v3704_v40, %v1513_v38  ;;  %v969_v33 = vld [vmem:[#allocation3 + $0x78] sm:$0xff]  ;;  %v1048_v4 = vld [vmem:[#allocation2 + $0x68] sm:$0xff] }
 0x2b7   :  { %v2135_v51 = vpop.eup %2134  ;;  %v1630_v2 = vsub.f32 0.0, %v1599_v60  ;;  %v1573_v23 = vmul.f32 %v2133_v61, %v1521_v54  ;;  %1031 = vst.msk [vmem:[#allocation3 + $0x60] sm:$0xff] %vm52_vm0, %v1014_v13  ;;  %v1078_v62 = vpop.xlane.xlu1 %1077  ;;  %v1528_v59 = vadd.f32 %v3706_v55, %v1512_v48  ;;  %v1047_v60 = vld [vmem:[#allocation2 + $0x60] sm:$0xff] }
 0x2b8   :  { %v2137_v17 = vpop.eup %2136  ;;  %v1663_v20 = vsel %vm1647_vm10, %v1631_v36, 0.0  ;;  %v1617_v12 = vmul.f32 0.6931472, %v2135_v51  ;;  %v1104_v28 = vadd.f32 %v1078_v62, %v1040_v29  ;;  %v1076_v25 = vpop.xlane.xlu0 %1075  ;;  %v2219_v51 = vld [vmem:[%s3887_s3 + $0x18] sm:$0xff] }
 0x2b9   :  { %v2139_v31 = vpop.eup %2138  ;;  %1679 = vst.msk [vmem:[%s3889_s5 + $0x8] sm:$0xff] %vm52_vm0, %v1663_v20  ;;  %v1662_v45 = vsel %vm1646_vm11, %v1630_v2, 0.0  ;;  %v1615_v5 = vmul.f32 0.6931472, %v2137_v17  ;;  %2154 = vlog2.f32 %v1573_v23  ;;  %v1539_v11 = vld [vmem:[#allocation3 + $0x28] sm:$0xff]  ;;  %v1103_v6 = vadd.f32 %v1076_v25, %v1039_v49  ;;  %v2218_v49 = vld [vmem:[%s3887_s3 + $0x10] sm:$0xff] }
 0x2ba   :  { %v2141_v39 = vpop.eup %2140  ;;  %2156 = vpow2.f32 %v1500_v15  ;;  %1678 = vst.msk [vmem:[%s3889_s5] sm:$0xff] %vm52_vm0, %v1662_v45  ;;  %v1639_v40 = vsub.f32 0.0, %v1617_v12  ;;  %v1571_v10 = vmul.f32 %v2139_v31, %v1520_v44  ;;  %v1538_v42 = vld [vmem:[#allocation3 + $0x20] sm:$0xff]  ;;  %1120 = vst.msk [vmem:[#allocation2 + $0x28] sm:$0xff] %vm52_vm0, %v1104_v28  ;;  %v1555_v58 = vadd.f32 %v3725_v3, %v1539_v11  ;;  %v1042_v44 = vld [vmem:[#allocation2 + $0x38] sm:$0xff] }
 0x2bb   :  { %v2143_v37 = vpop.eup %2142  ;;  %v1638_v9 = vsub.f32 0.0, %v1615_v5  ;;  %v1589_v24 = vmul.f32 %v2141_v39, %v1529_v16  ;;  %v1554_v34 = vadd.f32 %v3712_v14, %v1538_v42  ;;  %1119 = vst.msk [vmem:[#allocation2 + $0x20] sm:$0xff] %vm52_vm0, %v1103_v6  ;;  %v985_v63 = vpop.xlane.xlu1 %984  ;;  %vm1648_vm13 = vcmp.ge.s32.totalorder %v2218_v49, 0  ;;  %v2220_v62 = vld [vmem:[%s3887_s3 + $0x58] sm:$0xff]  ;;  %v1041_v16 = vld [vmem:[#allocation2 + $0x30] sm:$0xff] }
 0x2bc   :  { %v1671_v18 = vsel %vm1655_vm2, %v1639_v40, 0.0  ;;  %2158 = vlog2.f32 %v1571_v10  ;;  %v1587_v19 = vmul.f32 %v2143_v37, %v1528_v59  ;;  %v1009_v21 = vadd.f32 %v985_v63, %v961_v43  ;;  %v983_v55 = vpop.xlane.xlu0 %982  ;;  %v3751_v35 = vpop.eup %2144  ;;  %v1050_v37 = vld [vmem:[#allocation2 + $0x78] sm:$0xff] }
 0x2bd   :  { %1687 = vst.msk [vmem:[%s3889_s5 + $0x48] sm:$0xff] %vm52_vm0, %v1671_v18  ;;  %v1670_v0 = vsel %vm1654_vm12, %v1638_v9, 0.0  ;;  %2160 = vlog2.f32 %v1589_v24  ;;  %v1008_v7 = vadd.f32 %v983_v55, %v960_v30  ;;  %v3758_v1 = vpop.eup %2146  ;;  %v1547_v32 = vld [vmem:[#allocation3 + $0x68] sm:$0xff]  ;;  %vm1649_vm14 = vcmp.ge.s32.totalorder %v2219_v51, 0  ;;  %v2221_v24 = vld [vmem:[%s3887_s3 + $0x50] sm:$0xff] }
 0x2be   :  { %1686 = vst.msk [vmem:[%s3889_s5 + $0x40] sm:$0xff] %vm52_vm0, %v1670_v0  ;;  %2162 = vlog2.f32 %v1587_v19  ;;  %1026 = vst.msk [vmem:[#allocation3 + $0x38] sm:$0xff] %vm52_vm0, %v1009_v21  ;;  %v3765_v57 = vpop.eup %2148  ;;  %v1546_v47 = vld [vmem:[#allocation3 + $0x60] sm:$0xff]  ;;  %vm1657_vm15 = vcmp.ge.s32.totalorder %v2220_v62, 0  ;;  %vm1656_vm1 = vcmp.ge.s32.totalorder %v2221_v24, 0  ;;  %v1049_v19 = vld [vmem:[#allocation2 + $0x70] sm:$0xff] }
 0x2bf   :  { %2164 = vrcp.f32 %v1555_v58  ;;  %1025 = vst.msk [vmem:[#allocation3 + $0x30] sm:$0xff] %vm52_vm0, %v1008_v7  ;;  %v1001_v27 = vpop.xlane.xlu1 %1000  ;;  %v3768_v46 = vpop.eup %2150  ;;  %v1562_v22 = vadd.f32 %v3758_v1, %v1546_v47 }
 0x2c0   :  { %2166 = vrcp.f32 %v1554_v34  ;;  %v1017_v50 = vadd.f32 %v1001_v27, %v969_v33  ;;  %v999_v8 = vpop.xlane.xlu0 %998  ;;  %v3770_v56 = vpop.eup %2152  ;;  %v1563_v52 = vadd.f32 %v3768_v46, %v1547_v32 }
 0x2c1   :  { %v1016_v53 = vadd.f32 %v999_v8, %v968_v26  ;;  %v1507_v61 = vld [vmem:[#allocation2 + $0x28] sm:$0xff] }
 0x2c2   :  { %1034 = vst.msk [vmem:[#allocation3 + $0x78] sm:$0xff] %vm52_vm0, %v1017_v50  ;;  %v1506_v41 = vld [vmem:[#allocation2 + $0x20] sm:$0xff]  ;;  %2168 = vrcp.f32 %v1563_v52  ;;  %v1523_v31 = vadd.f32 %v3725_v3, %v1507_v61 }
 0x2c3   :  { %v2155_v54 = vpop.eup %2154  ;;  %1033 = vst.msk [vmem:[#allocation3 + $0x70] sm:$0xff] %vm52_vm0, %v1016_v53  ;;  %v1094_v38 = vpop.xlane.xlu1 %1093  ;;  %2170 = vrcp.f32 %v1562_v22  ;;  %v1522_v45 = vadd.f32 %v3712_v14, %v1506_v41 }
 0x2c4   :  { %v3776_v13 = vpop.eup %2156  ;;  %v1605_v29 = vmul.f32 0.6931472, %v2155_v54  ;;  %v1112_v15 = vadd.f32 %v1094_v38, %v1048_v4  ;;  %v1092_v36 = vpop.xlane.xlu0 %1091 }
 0x2c5   :  { %v1541_v2 = vld [vmem:[#allocation3 + $0x38] sm:$0xff]  ;;  %v1111_v23 = vadd.f32 %v1092_v36, %v1047_v60 }
 0x2c6   :  { %v2159_v48 = vpop.eup %2158  ;;  %v1633_v17 = vsub.f32 0.0, %v1605_v29  ;;  %v1557_v20 = vadd.f32 %v3770_v56, %v1541_v2  ;;  %v1540_v12 = vld [vmem:[#allocation3 + $0x30] sm:$0xff]  ;;  %1128 = vst.msk [vmem:[#allocation2 + $0x68] sm:$0xff] %vm52_vm0, %v1112_v15 }
 0x2c7   :  { %v2161_v28 = vpop.eup %2160  ;;  %v1603_v25 = vmul.f32 0.6931472, %v2159_v48  ;;  %v1556_v5 = vadd.f32 %v3751_v35, %v1540_v12  ;;  %1127 = vst.msk [vmem:[#allocation2 + $0x60] sm:$0xff] %vm52_vm0, %v1111_v23  ;;  %v1082_v11 = vpop.xlane.xlu1 %1081 }
 0x2c8   :  { %v2163_v6 = vpop.eup %2162  ;;  %v1665_v43 = vsel %vm1649_vm14, %v1633_v17, 0.0  ;;  %v1621_v39 = vmul.f32 0.6931472, %v2161_v28  ;;  %2172 = vrcp.f32 %v1557_v20  ;;  %v1106_v40 = vadd.f32 %v1082_v11, %v1042_v44  ;;  %v1080_v10 = vpop.xlane.xlu0 %1079 }
 0x2c9   :  { %v2165_v59 = vpop.eup %2164  ;;  %1681 = vst.msk [vmem:[%s3889_s5 + $0x18] sm:$0xff] %vm52_vm0, %v1665_v43  ;;  %v1632_v3 = vsub.f32 0.0, %v1603_v25  ;;  %v1619_v14 = vmul.f32 0.6931472, %v2163_v6  ;;  %2174 = vrcp.f32 %v1556_v5  ;;  %v1549_v42 = vld [vmem:[#allocation3 + $0x78] sm:$0xff]  ;;  %v1105_v30 = vadd.f32 %v1080_v10, %v1041_v16  ;;  %v2223_v16 = vld [vmem:[%s3887_s3 + $0x20] sm:$0xff] }
 0x2ca   :  { %v2167_v9 = vpop.eup %2166  ;;  %v1641_v58 = vsub.f32 0.0, %v1621_v39  ;;  %v1577_v34 = vmul.f32 %v2165_v59, %v1523_v31  ;;  %v1565_v63 = vadd.f32 %v3776_v13, %v1549_v42  ;;  %v1548_v18 = vld [vmem:[#allocation3 + $0x70] sm:$0xff]  ;;  %1122 = vst.msk [vmem:[#allocation2 + $0x38] sm:$0xff] %vm52_vm0, %v1106_v40  ;;  %vm1650_vm5 = vcmp.ge.s32.totalorder %v2223_v16, 0  ;;  %v2224_v43 = vld [vmem:[%s3887_s3 + $0x68] sm:$0xff]  ;;  %v2225_v40 = vld [vmem:[%s3887_s3 + $0x60] sm:$0xff] }
 0x2cb   :  { %v1664_v21 = vsel %vm1648_vm13, %v1632_v3, 0.0  ;;  %v1640_v55 = vsub.f32 0.0, %v1619_v14  ;;  %v1575_v0 = vmul.f32 %v2167_v9, %v1522_v45  ;;  %v1564_v7 = vadd.f32 %v3765_v57, %v1548_v18  ;;  %1121 = vst.msk [vmem:[#allocation2 + $0x30] sm:$0xff] %vm52_vm0, %v1105_v30  ;;  %v1098_v33 = vpop.xlane.xlu1 %1097 }
 0x2cc   :  { %1680 = vst.msk [vmem:[%s3889_s5 + $0x10] sm:$0xff] %vm52_vm0, %v1664_v21  ;;  %v1673_v32 = vsel %vm1657_vm15, %v1641_v58, 0.0  ;;  %2176 = vlog2.f32 %v1577_v34  ;;  %v1114_v26 = vadd.f32 %v1098_v33, %v1050_v37  ;;  %v1096_v47 = vpop.xlane.xlu0 %1095  ;;  %v2169_v4 = vpop.eup %2168  ;;  %vm1659_vm3 = vcmp.ge.s32.totalorder %v2224_v43, 0  ;;  %v2226_v37 = vld [vmem:[%s3887_s3 + $0x38] sm:$0xff]  ;;  %v2227_v58 = vld [vmem:[%s3887_s3 + $0x30] sm:$0xff] }
 0x2cd   :  { %1689 = vst.msk [vmem:[%s3889_s5 + $0x58] sm:$0xff] %vm52_vm0, %v1673_v32  ;;  %v1672_v27 = vsel %vm1656_vm1, %v1640_v55, 0.0  ;;  %2178 = vlog2.f32 %v1575_v0  ;;  %v1515_v50 = vld [vmem:[#allocation2 + $0x68] sm:$0xff]  ;;  %v1113_v8 = vadd.f32 %v1096_v47, %v1049_v19  ;;  %v2171_v60 = vpop.eup %2170  ;;  %vm1658_vm6 = vcmp.ge.s32.totalorder %v2225_v40, 0  ;;  %v2229_v32 = vld [vmem:[%s3887_s3 + $0x70] sm:$0xff] }
 0x2ce   :  { %1688 = vst.msk [vmem:[%s3889_s5 + $0x50] sm:$0xff] %vm52_vm0, %v1672_v27  ;;  %2180 = vrcp.f32 %v1565_v63  ;;  %v1531_v52 = vadd.f32 %v3768_v46, %v1515_v50  ;;  %v1514_v53 = vld [vmem:[#allocation2 + $0x60] sm:$0xff]  ;;  %1130 = vst.msk [vmem:[#allocation2 + $0x78] sm:$0xff] %vm52_vm0, %v1114_v26  ;;  %vm1653_vm7 = vcmp.ge.s32.totalorder %v2226_v37, 0  ;;  %vm1652_vm8 = vcmp.ge.s32.totalorder %v2227_v58, 0 }
 0x2cf   :  { %2182 = vrcp.f32 %v1564_v7  ;;  %v1530_v22 = vadd.f32 %v3758_v1, %v1514_v53  ;;  %1129 = vst.msk [vmem:[#allocation2 + $0x70] sm:$0xff] %vm52_vm0, %v1113_v8  ;;  %v2228_v7 = vld [vmem:[%s3887_s3 + $0x78] sm:$0xff]  ;;  %vm1660_vm10 = vcmp.ge.s32.totalorder %v2229_v32, 0 }
 0x2d0   :  { %v1593_v54 = vmul.f32 %v2169_v4, %v1531_v52  ;;  %vm1661_vm9 = vcmp.ge.s32.totalorder %v2228_v7, 0 }
 0x2d1   :  { %v1591_v38 = vmul.f32 %v2171_v60, %v1530_v22  ;;  %v1509_v29 = vld [vmem:[#allocation2 + $0x38] sm:$0xff] }
 0x2d2   :  { %v2173_v61 = vpop.eup %2172  ;;  %2184 = vlog2.f32 %v1593_v54  ;;  %v1525_v41 = vadd.f32 %v3770_v56, %v1509_v29  ;;  %v1508_v15 = vld [vmem:[#allocation2 + $0x30] sm:$0xff]  ;;  %v2222_v56 = vld [vmem:[%s3887_s3 + $0x28] sm:$0xff] }
 0x2d3   :  { %v2175_v36 = vpop.eup %2174  ;;  %2186 = vlog2.f32 %v1591_v38  ;;  %v1524_v46 = vadd.f32 %v3751_v35, %v1508_v15  ;;  %vm1651_vm4 = vcmp.ge.s32.totalorder %v2222_v56, 0 }
 0x2d4   :  { %v1581_v49 = vmul.f32 %v2173_v61, %v1525_v41 }
 0x2d5   :  { %v1579_v51 = vmul.f32 %v2175_v36, %v1524_v46  ;;  %v1517_v2 = vld [vmem:[#allocation2 + $0x78] sm:$0xff] }
 0x2d6   :  { %v2177_v23 = vpop.eup %2176  ;;  %2188 = vlog2.f32 %v1581_v49  ;;  %v1533_v1 = vadd.f32 %v3776_v13, %v1517_v2  ;;  %v1516_v44 = vld [vmem:[#allocation2 + $0x70] sm:$0xff] }
 0x2d7   :  { %v2179_v48 = vpop.eup %2178  ;;  %v1609_v62 = vmul.f32 0.6931472, %v2177_v23  ;;  %2190 = vlog2.f32 %v1579_v51  ;;  %v1532_v17 = vadd.f32 %v3765_v57, %v1516_v44 }
 0x2d8   :  { %v2181_v20 = vpop.eup %2180  ;;  %v1607_v35 = vmul.f32 0.6931472, %v2179_v48 }
 0x2d9   :  { %v2183_v12 = vpop.eup %2182  ;;  %v1635_v13 = vsub.f32 0.0, %v1609_v62  ;;  %v1597_v28 = vmul.f32 %v2181_v20, %v1533_v1 }
 0x2da   :  { %v1634_v25 = vsub.f32 0.0, %v1607_v35  ;;  %v1595_v31 = vmul.f32 %v2183_v12, %v1532_v17 }
 0x2db   :  { %v1667_v45 = vsel %vm1651_vm4, %v1635_v13, 0.0  ;;  %2192 = vlog2.f32 %v1597_v28 }
 0x2dc   :  { %v2185_v57 = vpop.eup %2184  ;;  %1683 = vst.msk [vmem:[%s3889_s5 + $0x28] sm:$0xff] %vm52_vm0, %v1667_v45  ;;  %v1666_v5 = vsel %vm1650_vm5, %v1634_v25, 0.0  ;;  %2194 = vlog2.f32 %v1595_v31 }
 0x2dd   :  { %v2187_v11 = vpop.eup %2186  ;;  %1682 = vst.msk [vmem:[%s3889_s5 + $0x20] sm:$0xff] %vm52_vm0, %v1666_v5  ;;  %v1625_v6 = vmul.f32 0.6931472, %v2185_v57 }
 0x2de   :  { %v1623_v39 = vmul.f32 0.6931472, %v2187_v11 }
 0x2df   :  { %v1643_v10 = vsub.f32 0.0, %v1625_v6 }
 0x2e0   :  { %v2189_v59 = vpop.eup %2188  ;;  %v1642_v3 = vsub.f32 0.0, %v1623_v39 }
 0x2e1   :  { %v2191_v14 = vpop.eup %2190  ;;  %v1675_v42 = vsel %vm1659_vm3, %v1643_v10, 0.0  ;;  %v1613_v30 = vmul.f32 0.6931472, %v2189_v59 }
 0x2e2   :  { %1691 = vst.msk [vmem:[%s3889_s5 + $0x68] sm:$0xff] %vm52_vm0, %v1675_v42  ;;  %v1674_v9 = vsel %vm1658_vm6, %v1642_v3, 0.0  ;;  %v1611_v24 = vmul.f32 0.6931472, %v2191_v14 }
 0x2e3   :  { %1690 = vst.msk [vmem:[%s3889_s5 + $0x60] sm:$0xff] %vm52_vm0, %v1674_v9  ;;  %v1637_v34 = vsub.f32 0.0, %v1613_v30 }
 0x2e4   :  { %v1636_v63 = vsub.f32 0.0, %v1611_v24 }
 0x2e5   :  { %v2193_v18 = vpop.eup %2192  ;;  %v1669_v19 = vsel %vm1653_vm7, %v1637_v34, 0.0 }
 0x2e6   :  { %v2195_v21 = vpop.eup %2194  ;;  %1685 = vst.msk [vmem:[%s3889_s5 + $0x38] sm:$0xff] %vm52_vm0, %v1669_v19  ;;  %v1668_v55 = vsel %vm1652_vm8, %v1636_v63, 0.0  ;;  %v1629_v0 = vmul.f32 0.6931472, %v2193_v18 }
 0x2e7   :  { %1684 = vst.msk [vmem:[%s3889_s5 + $0x30] sm:$0xff] %vm52_vm0, %v1668_v55  ;;  %v1627_v33 = vmul.f32 0.6931472, %v2195_v21 }
 0x2e8   :  { %v1645_v26 = vsub.f32 0.0, %v1629_v0 }
 0x2e9   :  { %v1644_v47 = vsub.f32 0.0, %v1627_v33 }
 0x2ea   :  { %v1677_v27 = vsel %vm1661_vm9, %v1645_v26, 0.0 }
 0x2eb   :  { %1693 = vst.msk [vmem:[%s3889_s5 + $0x78] sm:$0xff] %vm52_vm0, %v1677_v27  ;;  %v1676_v50 = vsel %vm1660_vm10, %v1644_v47, 0.0 }
 0x2ec   :  { %1692 = vst.msk [vmem:[%s3889_s5 + $0x70] sm:$0xff] %vm52_vm0, %v1676_v50 }
 0x2ed   :  { %1698 = vsyncpa [#allocation5], 1 }
 0x2ee   :  { %1699 = vsyncpa [#allocation7], 1 }

</bundles_post_ra>
